<compile_context>
chip_gen: v7x
topology: tpu7x:2x2x1
jax: 0.10.0
libtpu: 0.0.40
codegen_flags: <defaults>
</compile_context>

<pallas_src>
import functools

import jax
import jax.numpy as jnp
from jax.experimental import pallas as pl
from jax.experimental.pallas import tpu as pltpu


def _round_up(x, m):
    return ((x + m - 1) // m) * m


# ----------------------------------------------------------------------------
# Kernel 1: fused  [im2col 3x3 conv + BN + LeakyReLU]  +  [1x1 conv 256->128]
#   One big-K bf16 matmul per M tile, f32 accumulation; y1 stays in VMEM.
# ----------------------------------------------------------------------------
def _conv1_conv2_kernel(p_ref, w1_ref, s1_ref, b1_ref, w2_ref, y2_ref):
    # p_ref : (TM, 9*Cin)  bf16 im2col patches
    # w1_ref: (9*Cin, C1)  bf16          s1/b1: (1, C1) f32 (folded BN)
    # w2_ref: (C1, C2)     bf16
    # y2_ref: (TM, C2)     f32
    y1 = jnp.dot(p_ref[...], w1_ref[...], preferred_element_type=jnp.float32)
    y1 = y1 * s1_ref[...] + b1_ref[...]
    y1 = jnp.where(y1 > 0.0, y1, 0.01 * y1)              # LeakyReLU(0.01)
    y2_ref[...] = jnp.dot(y1.astype(jnp.bfloat16), w2_ref[...],
                          preferred_element_type=jnp.float32)


def conv1_conv2(patches, w1_mat, scale1, bias1, w2, *, tile_m):
    M, K9 = patches.shape
    C1 = w1_mat.shape[1]
    C2 = w2.shape[1]
    # VMEM @ tile_m=256 (bf16): patches 2*1.125MB + w1 2*1.125MB + out 2*128KB
    # -> well under the default scoped limit on v5e/v6e/v7x.
    return pl.pallas_call(
        _conv1_conv2_kernel,
        out_shape=jax.ShapeDtypeStruct((M, C2), jnp.float32),
        grid=(M // tile_m,),
        in_specs=[
            pl.BlockSpec((tile_m, K9), lambda i: (i, 0)),
            pl.BlockSpec((K9, C1), lambda i: (0, 0)),   # constant block: no re-DMA
            pl.BlockSpec((1, C1), lambda i: (0, 0)),
            pl.BlockSpec((1, C1), lambda i: (0, 0)),
            pl.BlockSpec((C1, C2), lambda i: (0, 0)),
        ],
        out_specs=pl.BlockSpec((tile_m, C2), lambda i: (i, 0)),
        compiler_params=pltpu.CompilerParams(
            dimension_semantics=("parallel",)),
    )(patches, w1_mat, scale1, bias1, w2)


# ----------------------------------------------------------------------------
# Kernel 2: per-batch QCO statistics fused with the whole 1-D head.
#   Outputs are lane-dense:  quant as (L, HW), head output as (L, 128).
# ----------------------------------------------------------------------------
def _stats_head_kernel(y2_ref, wf1_ref, wf2_ref, wout_ref, so_ref, bo_ref,
                       quant_ref, out_ref, *, level_num):
    L = level_num
    x = y2_ref[0]                                           # (HW, C) f32
    HW, C = x.shape

    # global average pool over spatial positions
    x_ave = jnp.mean(x, axis=0, keepdims=True)              # (1, C)

    # F.normalize(..., dim=channel) semantics: clamp each norm at 1e-12
    x_norm = jnp.sqrt(jnp.sum(x * x, axis=1, keepdims=True))            # (HW, 1)
    ave_norm = jnp.sqrt(jnp.sum(x_ave * x_ave, axis=1, keepdims=True))  # (1, 1)
    x_n = x / jnp.maximum(x_norm, 1e-12)
    ave_n = x_ave / jnp.maximum(ave_norm, 1e-12)

    # cosine similarity directly as a lane-dense row: (1, HW) = ave_n @ x_n^T
    cos_row = jax.lax.dot_general(ave_n, x_n, (((1,), (1,)), ((), ())),
                                  preferred_element_type=jnp.float32)

    cs_min = jnp.min(cos_row)
    cs_max = jnp.max(cos_row)
    rng = cs_max - cs_min
    inter = rng / L                                         # q_levels[1]-q_levels[0]

    # quantization levels as a column: (L, 1)
    lev = jax.lax.broadcasted_iota(jnp.float32, (L, 1), 0)
    q_levels = (2.0 * lev + 1.0) / (2.0 * L) * rng + cs_min

    # quant in lane-dense (L, HW) layout (wrapper transposes to (HW, L))
    quant = 1.0 - jnp.abs(q_levels - cos_row)               # (L, HW)
    quant = quant * (quant > (1.0 - inter)).astype(jnp.float32)
    quant_ref[0] = quant

    # histogram over positions + normalization (eps guards cs_max == cs_min)
    sta = jnp.sum(quant, axis=1, keepdims=True)             # (L, 1)
    sta = sta / jnp.maximum(jnp.sum(sta), 1e-12)

    # --- f1: Conv1d(2 -> 64, k=1) as two VPU FMAs (no MXU for K=2), LeakyReLU
    h1 = q_levels * wf1_ref[0:1, :] + sta * wf1_ref[1:2, :]  # (L, 64)
    h1 = jnp.where(h1 > 0.0, h1, 0.01 * h1)

    # --- f2: Conv1d(64 -> 128, k=1) + ReLU
    h2 = jnp.dot(h1, wf2_ref[...], preferred_element_type=jnp.float32)  # (L, 128)
    h2 = jnp.maximum(h2, 0.0)

    # --- out: Conv1d(256 -> 128, k=1) on cat([h2, x_ave]) + BN1d + ReLU
    #     split the concat:  cat @ wout == h2 @ wout[:Ch] + x_ave @ wout[Ch:]
    Ch = h2.shape[1]
    y = jnp.dot(h2, wout_ref[0:Ch, :], preferred_element_type=jnp.float32)
    y = y + jnp.dot(x_ave, wout_ref[Ch:, :], preferred_element_type=jnp.float32)
    y = y * so_ref[...] + bo_ref[...]
    out_ref[0] = jnp.maximum(y, 0.0)                        # (L, 128) lane-dense


def stats_head(y2, wf1, wf2, wout, scale_o, bias_o, level_num):
    N, HW, C2 = y2.shape
    L = level_num
    Ch = wf2.shape[1]
    kernel = functools.partial(_stats_head_kernel, level_num=L)
    return pl.pallas_call(
        kernel,
        out_shape=(
            jax.ShapeDtypeStruct((N, L, HW), jnp.float32),
            jax.ShapeDtypeStruct((N, L, Ch), jnp.float32),
        ),
        grid=(N,),
        in_specs=[
            pl.BlockSpec((1, HW, C2), lambda n: (n, 0, 0)),
            pl.BlockSpec(wf1.shape, lambda n: (0, 0)),
            pl.BlockSpec(wf2.shape, lambda n: (0, 0)),
            pl.BlockSpec(wout.shape, lambda n: (0, 0)),
            pl.BlockSpec((1, Ch), lambda n: (0, 0)),
            pl.BlockSpec((1, Ch), lambda n: (0, 0)),
        ],
        out_specs=(
            pl.BlockSpec((1, L, HW), lambda n: (n, 0, 0)),
            pl.BlockSpec((1, L, Ch), lambda n: (n, 0, 0)),
        ),
        compiler_params=pltpu.CompilerParams(
            dimension_semantics=("parallel",)),
    )(y2, wf1, wf2, wout, scale_o, bias_o)


# ----------------------------------------------------------------------------
# Full forward pass.
# ----------------------------------------------------------------------------
def qco_1d_ch_forward(x_nchw, p, level_num):
    N, Cin, H, W = x_nchw.shape
    L = level_num
    eps = 1e-5
    C1 = p["w1"].shape[-1]     # 256
    C2 = p["w2"].shape[-1]     # 128

    # Fold BatchNorm (inference form) into per-channel scale / bias.
    scale1 = p["bn1_gamma"] / jnp.sqrt(p["bn1_var"] + eps)
    bias1 = p["bn1_beta"] - p["bn1_mean"] * scale1
    scale_o = p["bno_gamma"] / jnp.sqrt(p["bno_var"] + eps)
    bias_o = p["bno_beta"] - p["bno_mean"] * scale_o

    # im2col for the 3x3 / pad=1 conv, done once in XLA (fused transpose +
    # pad + gather), fed to the Pallas matmul in bf16.
    # TODO(synk): at very large H,W move the patch extraction in-kernel
    # (halo DMA) to avoid the 9x patch materialization in HBM.
    x_nhwc = jnp.transpose(x_nchw, (0, 2, 3, 1)).astype(jnp.bfloat16)
    x_pad = jnp.pad(x_nhwc, ((0, 0), (1, 1), (1, 1), (0, 0)))
    patches = jnp.stack(
        [x_pad[:, kh:kh + H, kw:kw + W, :]
         for kh in range(3) for kw in range(3)], axis=3)    # (N, H, W, 9, Cin)
    M = N * H * W
    patches = patches.reshape(M, 9 * Cin)

    # M tile: >=128 rows for MXU utilization; multiple grid steps (v7x 2 TCs)
    # once M is large.  Pad M so the tile divides evenly.
    tile_m = min(256, _round_up(M, 8))
    M_pad = _round_up(M, tile_m)
    if M_pad != M:
        patches = jnp.pad(patches, ((0, M_pad - M), (0, 0)))

    w1_mat = p["w1"].reshape(9 * Cin, C1).astype(jnp.bfloat16)
    w2 = p["w2"].astype(jnp.bfloat16)

    y2 = conv1_conv2(patches, w1_mat, scale1[None, :], bias1[None, :], w2,
                     tile_m=tile_m)                         # (M_pad, 128) f32
    y2 = y2[:M].reshape(N, H * W, C2)

    quant_lhw, out_lc = stats_head(
        y2, p["wf1"], p["wf2"], p["wout"],
        scale_o[None, :], bias_o[None, :], L)
    # quant_lhw: (N, L, HW) lane-dense; out_lc: (N, L, 128) lane-dense.

    sta = jnp.transpose(out_lc, (0, 2, 1))                  # (N, 128, L)
    quant = jnp.transpose(quant_lhw, (0, 2, 1))             # (N, HW, L)
    return sta, quant


# ----------------------------------------------------------------------------
# Driver
# ----------------------------------------------------------------------------
if __name__ == "__main__":
    N, C_IN, H, W = 2, 256, 8, 8
    LEVEL_NUM = 8

    key = jax.random.PRNGKey(0)
    ks = jax.random.split(key, 16)

    x = jax.random.normal(ks[0], (N, C_IN, H, W), jnp.float32)

    params = {
        # conv1 weight in (kh, kw, Cin, Cout) layout
        "w1": jax.random.normal(ks[1], (3, 3, 256, 256), jnp.float32) * 0.02,
        "bn1_gamma": 1.0 + 0.1 * jax.random.normal(ks[2], (256,), jnp.float32),
        "bn1_beta": 0.1 * jax.random.normal(ks[3], (256,), jnp.float32),
        "bn1_mean": 0.1 * jax.random.normal(ks[4], (256,), jnp.float32),
        "bn1_var": 1.0 + 0.1 * jax.random.uniform(ks[5], (256,), jnp.float32),
        # 1x1 conv weights stored as (Cin, Cout)
        "w2": jax.random.normal(ks[6], (256, 128), jnp.float32) * 0.05,
        "wf1": jax.random.normal(ks[7], (2, 64), jnp.float32) * 0.5,
        "wf2": jax.random.normal(ks[8], (64, 128), jnp.float32) * 0.1,
        "wout": jax.random.normal(ks[9], (256, 128), jnp.float32) * 0.05,
        "bno_gamma": 1.0 + 0.1 * jax.random.normal(ks[10], (128,), jnp.float32),
        "bno_beta": 0.1 * jax.random.normal(ks[11], (128,), jnp.float32),
        "bno_mean": 0.1 * jax.random.normal(ks[12], (128,), jnp.float32),
        "bno_var": 1.0 + 0.1 * jax.random.uniform(ks[13], (128,), jnp.float32),
    }

    sta_out, quant_out = qco_1d_ch_forward(x, params, LEVEL_NUM)
    sta_out = jax.block_until_ready(sta_out)
    quant_out = jax.block_until_ready(quant_out)

    assert sta_out.shape == (N, 128, LEVEL_NUM), sta_out.shape
    assert quant_out.shape == (N, H * W, LEVEL_NUM), quant_out.shape
    assert bool(jnp.all(jnp.isfinite(sta_out))) and bool(jnp.all(jnp.isfinite(quant_out)))

    print("KERNEL_OK")
</pallas_src>

<mosaic_0001>
module attributes {stable_mosaic.version = 11 : i64} {
  func.func @_conv1_conv2_kernel(%arg0: i32, %arg1: memref<128x2304xbf16, #tpu.memory_space<vmem>>, %arg2: memref<2304x256xbf16, #tpu.memory_space<vmem>>, %arg3: memref<1x256xf32, #tpu.memory_space<vmem>>, %arg4: memref<1x256xf32, #tpu.memory_space<vmem>>, %arg5: memref<256x128xbf16, #tpu.memory_space<vmem>>, %arg6: memref<128x128xf32, #tpu.memory_space<vmem>>) attributes {dimension_semantics = [#tpu.dimension_semantics<parallel>], iteration_bounds = array<i64: 1>, scalar_prefetch = 0 : i64, scratch_operands = 0 : i64, tpu.core_type = #tpu.core_type<tc>, window_params = [{transform_indices = @transform_0, window_bounds = array<i64: 128, 2304>}, {pipeline_mode = #tpu.pipeline_mode<synchronous>, transform_indices = @transform_1, window_bounds = array<i64: 2304, 256>}, {pipeline_mode = #tpu.pipeline_mode<synchronous>, transform_indices = @transform_2, window_bounds = array<i64: 1, 256>}, {pipeline_mode = #tpu.pipeline_mode<synchronous>, transform_indices = @transform_3, window_bounds = array<i64: 1, 256>}, {pipeline_mode = #tpu.pipeline_mode<synchronous>, transform_indices = @transform_4, window_bounds = array<i64: 256, 128>}, {transform_indices = @transform_5, window_bounds = array<i64: 128, 128>}]} {
    %c0 = arith.constant 0 : index
    %c0_0 = arith.constant 0 : index
    %0 = vector.load %arg1[%c0, %c0_0] : memref<128x2304xbf16, #tpu.memory_space<vmem>>, vector<128x2304xbf16>
    %c0_1 = arith.constant 0 : index
    %c0_2 = arith.constant 0 : index
    %1 = vector.load %arg2[%c0_1, %c0_2] : memref<2304x256xbf16, #tpu.memory_space<vmem>>, vector<2304x256xbf16>
    %cst = arith.constant dense<0.000000e+00> : vector<128x256xf32>
    %2 = tpu.matmul %0, %1, %cst {dimension_numbers = #tpu.dot_dimension_numbers<[1], [0], [0], [1], [0, 0, 1, 1], [], []>} : vector<128x2304xbf16>, vector<2304x256xbf16>, vector<128x256xf32> -> vector<128x256xf32>
    %c0_3 = arith.constant 0 : index
    %c0_4 = arith.constant 0 : index
    %3 = vector.load %arg3[%c0_3, %c0_4] : memref<1x256xf32, #tpu.memory_space<vmem>>, vector<1x256xf32>
    %4 = vector.broadcast %3 : vector<1x256xf32> to vector<128x256xf32>
    %5 = arith.mulf %2, %4 : vector<128x256xf32>
    %c0_5 = arith.constant 0 : index
    %c0_6 = arith.constant 0 : index
    %6 = vector.load %arg4[%c0_5, %c0_6] : memref<1x256xf32, #tpu.memory_space<vmem>>, vector<1x256xf32>
    %7 = vector.broadcast %6 : vector<1x256xf32> to vector<128x256xf32>
    %8 = arith.addf %5, %7 : vector<128x256xf32>
    %cst_7 = arith.constant 0.000000e+00 : f32
    %9 = vector.broadcast %cst_7 : f32 to vector<128x256xf32>
    %10 = arith.cmpf ogt, %8, %9 : vector<128x256xf32>
    %cst_8 = arith.constant 0.00999999977 : f32
    %11 = vector.broadcast %cst_8 : f32 to vector<128x256xf32>
    %12 = arith.mulf %11, %8 : vector<128x256xf32>
    %13 = arith.select %10, %8, %12 : vector<128x256xi1>, vector<128x256xf32>
    %14 = arith.truncf %13 : vector<128x256xf32> to vector<128x256xbf16>
    %c0_9 = arith.constant 0 : index
    %c0_10 = arith.constant 0 : index
    %15 = vector.load %arg5[%c0_9, %c0_10] : memref<256x128xbf16, #tpu.memory_space<vmem>>, vector<256x128xbf16>
    %cst_11 = arith.constant dense<0.000000e+00> : vector<128x128xf32>
    %16 = tpu.matmul %14, %15, %cst_11 {dimension_numbers = #tpu.dot_dimension_numbers<[1], [0], [0], [1], [0, 0, 1, 1], [], []>} : vector<128x256xbf16>, vector<256x128xbf16>, vector<128x128xf32> -> vector<128x128xf32>
    %c0_12 = arith.constant 0 : index
    %c0_13 = arith.constant 0 : index
    %17 = vector.load %arg6[%c0_12, %c0_13] : memref<128x128xf32, #tpu.memory_space<vmem>>, vector<128x128xf32>
    tpu.vector_store %arg6[%c0_12, %c0_13], %16 {strides = array<i32>} : memref<128x128xf32, #tpu.memory_space<vmem>>, vector<128x128xf32>,
    return
  }
  func.func @transform_0(%arg0: i32) -> (i32, i32) {
    %c0_i32 = arith.constant 0 : i32
    %c0_i32_0 = arith.constant 0 : i32
    return %arg0, %c0_i32 : i32, i32
  }
  func.func @transform_1(%arg0: i32) -> (i32, i32) {
    %c0_i32 = arith.constant 0 : i32
    %c0_i32_0 = arith.constant 0 : i32
    %c0_i32_1 = arith.constant 0 : i32
    return %c0_i32, %c0_i32_0 : i32, i32
  }
  func.func @transform_2(%arg0: i32) -> (i32, i32) {
    %c0_i32 = arith.constant 0 : i32
    %c0_i32_0 = arith.constant 0 : i32
    %c0_i32_1 = arith.constant 0 : i32
    return %c0_i32, %c0_i32_0 : i32, i32
  }
  func.func @transform_3(%arg0: i32) -> (i32, i32) {
    %c0_i32 = arith.constant 0 : i32
    %c0_i32_0 = arith.constant 0 : i32
    %c0_i32_1 = arith.constant 0 : i32
    return %c0_i32, %c0_i32_0 : i32, i32
  }
  func.func @transform_4(%arg0: i32) -> (i32, i32) {
    %c0_i32 = arith.constant 0 : i32
    %c0_i32_0 = arith.constant 0 : i32
    %c0_i32_1 = arith.constant 0 : i32
    return %c0_i32, %c0_i32_0 : i32, i32
  }
  func.func @transform_5(%arg0: i32) -> (i32, i32) {
    %c0_i32 = arith.constant 0 : i32
    %c0_i32_0 = arith.constant 0 : i32
    return %arg0, %c0_i32 : i32, i32
  }
}

</mosaic_0001>

<bundles_post_ra>
// kernel: tpu_custom_call.1
= control target key start
LH: loop header
LB: loop body
LE: loop exit
PB: predicated region body
PF: predicated region fallthrough
CT: control target
= control target key end

     0   :  { %10 = vsyncpa [#allocation3], 0  ;;  %s6012_s0 = inlined_call_operand.hbm [shape: bf16[128,2304], index: 0, kind: input, shape index: {}]   ;;  %s6013_s1 = inlined_call_operand.hbm [shape: bf16[2304,256], index: 1, kind: input, shape index: {}]   ;;  %s6014_s2 = inlined_call_operand.hbm [shape: f32[1,256], index: 2, kind: input, shape index: {}]   ;;  %s6015_s3 = inlined_call_operand.hbm [shape: f32[1,256], index: 3, kind: input, shape index: {}]   ;;  %s6016_s4 = inlined_call_operand.hbm [shape: bf16[256,128], index: 4, kind: input, shape index: {}]   ;;  %s6017_s5 = inlined_call_operand.hbm [shape: f32[128,128], index: 5, kind: output, shape index: {}]  }
   0x1   :  { %11 = vsyncpa [#allocation6], 0 }
   0x2   :  { %12 = vsyncpa [#allocation9], 0 }
   0x3   :  { %13 = vsyncpa [#allocation4], 0  ;;  %s5739_s18 = smov [#allocation5]   ;;  %s5599_s22 = scalar_lea.hbm %s6013_s1, 36864 }
   0x4   :  { %s31_s19 = sshll.u32 %s5739_s18, 4  ;;  %p5600_p0 = scmp.ne.s32.totalorder %s6013_s1, %s5599_s22  ;;  %s32_s19 = int_to_ptr.vmem [resolvable:$true] %s31_s19 }
   0x5   :  { %p5603_p1 = scmp.lt.u32.totalorder %s5599_s22, %s6013_s1 }
   0x7   :  { %p5605_p2 = pnand %p5603_p1, %p5600_p0 }
   0x9   :  { %5608 = shalt.err (!%p5605_p2)
}
   0xa   :  { %s5609_s27 = scalar_lea.vmem %s32_s19, 36864  ;;  %p5614_p4 = scmp.lt.s32.totalorder %s32_s19, %s32_s19 }
   0xb   :  { %p5610_p3 = scmp.ne.s32.totalorder %s32_s19, %s5609_s27  ;;  %p5615_p5 = scmp.lt.s32.totalorder %s5609_s27, %s5609_s27 }
   0xd   :  { %p5616_p6 = por %p5615_p5, %p5614_p4 }
   0xf   :  { %p5617_p7 = pnand %p5616_p6, %p5610_p3 }
  0x11   :  { %5620 = shalt.err (!%p5617_p7)
}
  0x12   :  { %s5740_s28 = smov 128   ;;  %s5741_s29 = smov 8  }
  0x13   :  { %37 = dma.hbm_to_vmem [thread:$0]  %s6013_s1, 36864, %s32_s19, [#allocation6], %s5740_s28, %s5740_s28, %s5741_s29  }
  0x14   :  { %s5742_s7 = smov [#allocation8]   ;;  %s5743_s9 = smov [#allocation2]  }
  0x15   :  { %s54_s8 = sshll.u32 %s5742_s7, 4  ;;  %s19_s10 = sshll.u32 %s5743_s9, 4  ;;  %s55_s8 = int_to_ptr.vmem [resolvable:$true] %s54_s8  ;;  %s20_s10 = int_to_ptr.vmem [resolvable:$true] %s19_s10 }
  0x16   :  { %s5621_s13 = scalar_lea.hbm %s6015_s3, 32 }
  0x17   :  { %p5622_p8 = scmp.ne.s32.totalorder %s6015_s3, %s5621_s13  ;;  %p5625_p9 = scmp.lt.u32.totalorder %s5621_s13, %s6015_s3 }
  0x19   :  { %p5627_p10 = pnand %p5625_p9, %p5622_p8 }
  0x1b   :  { %5630 = shalt.err (!%p5627_p10)
}
  0x1c   :  { %s5631_s1 = scalar_lea.vmem %s55_s8, 32  ;;  %p5636_p12 = scmp.lt.s32.totalorder %s55_s8, %s55_s8 }
  0x1d   :  { %p5632_p11 = scmp.ne.s32.totalorder %s55_s8, %s5631_s1  ;;  %p5637_p13 = scmp.lt.s32.totalorder %s5631_s1, %s5631_s1 }
  0x1f   :  { %p5638_p0 = por %p5637_p13, %p5636_p12 }
  0x21   :  { %p5639_p1 = pnand %p5638_p0, %p5632_p11 }
  0x23   :  { %5642 = shalt.err (!%p5639_p1)
}
  0x24   :  { %57 = dma.hbm_to_vmem [thread:$0]  %s6015_s3, 32, %s55_s8, [#allocation9]  }
  0x25   :  { %s5643_s22 = scalar_lea.hbm %s6012_s0, 18432 }
  0x26   :  { %p5644_p2 = scmp.ne.s32.totalorder %s6012_s0, %s5643_s22  ;;  %p5647_p3 = scmp.lt.u32.totalorder %s5643_s22, %s6012_s0 }
  0x28   :  { %p5649_p4 = pnand %p5647_p3, %p5644_p2 }
  0x2a   :  { %5652 = shalt.err (!%p5649_p4)
}
  0x2b   :  { %s5653_s27 = scalar_lea.vmem %s20_s10, 18432  ;;  %p5658_p6 = scmp.lt.s32.totalorder %s20_s10, %s20_s10 }
  0x2c   :  { %p5654_p5 = scmp.ne.s32.totalorder %s20_s10, %s5653_s27  ;;  %p5659_p7 = scmp.lt.s32.totalorder %s5653_s27, %s5653_s27 }
  0x2e   :  { %p5660_p8 = por %p5659_p7, %p5658_p6 }
  0x30   :  { %p5661_p9 = pnand %p5660_p8, %p5654_p5 }
  0x32   :  { %5664 = shalt.err (!%p5661_p9)
}
  0x33   :  { %s5744_s3 = smov 1152   ;;  %s5745_s30 = smov 72  }
  0x34   :  { %25 = dma.hbm_to_vmem [thread:$0]  %s6012_s0, 18432, %s20_s10, [#allocation3], %s5744_s3, %s5744_s3, %s5745_s30  }
  0x35   :  { %s5746_s8 = smov [#allocation7]   ;;  %s5747_s11 = smov [#allocation10]  }
  0x36   :  { %s44_s9 = sshll.u32 %s5746_s8, 4  ;;  %s63_s12 = sshll.u32 %s5747_s11, 4  ;;  %s45_s9 = int_to_ptr.vmem [resolvable:$true] %s44_s9  ;;  %s64_s12 = int_to_ptr.vmem [resolvable:$true] %s63_s12 }
  0x37   :  { %s5665_s15 = scalar_lea.hbm %s6014_s2, 32 }
  0x38   :  { %p5666_p10 = scmp.ne.s32.totalorder %s6014_s2, %s5665_s15  ;;  %p5669_p11 = scmp.lt.u32.totalorder %s5665_s15, %s6014_s2 }
  0x3a   :  { %p5671_p12 = pnand %p5669_p11, %p5666_p10 }
  0x3c   :  { %5674 = shalt.err (!%p5671_p12)
}
  0x3d   :  { %s5675_s0 = scalar_lea.vmem %s45_s9, 32  ;;  %p5680_p0 = scmp.lt.s32.totalorder %s45_s9, %s45_s9 }
  0x3e   :  { %p5676_p13 = scmp.ne.s32.totalorder %s45_s9, %s5675_s0  ;;  %p5681_p1 = scmp.lt.s32.totalorder %s5675_s0, %s5675_s0 }
  0x40   :  { %p5682_p2 = por %p5681_p1, %p5680_p0 }
  0x42   :  { %p5683_p3 = pnand %p5682_p2, %p5676_p13 }
  0x44   :  { %5686 = shalt.err (!%p5683_p3)
}
  0x45   :  { %47 = dma.hbm_to_vmem [thread:$0]  %s6014_s2, 32, %s45_s9, [#allocation6]  }
  0x46   :  { %s5687_s22 = scalar_lea.hbm %s6016_s4, 2048 }
  0x47   :  { %p5688_p4 = scmp.ne.s32.totalorder %s6016_s4, %s5687_s22  ;;  %p5691_p5 = scmp.lt.u32.totalorder %s5687_s22, %s6016_s4 }
  0x49   :  { %p5693_p6 = pnand %p5691_p5, %p5688_p4 }
  0x4b   :  { %5696 = shalt.err (!%p5693_p6)
}
  0x4c   :  { %s5697_s27 = scalar_lea.vmem %s64_s12, 2048  ;;  %p5702_p8 = scmp.lt.s32.totalorder %s64_s12, %s64_s12 }
  0x4d   :  { %p5698_p7 = scmp.ne.s32.totalorder %s64_s12, %s5697_s27  ;;  %p5703_p9 = scmp.lt.s32.totalorder %s5697_s27, %s5697_s27 }
  0x4f   :  { %p5704_p10 = por %p5703_p9, %p5702_p8 }
  0x51   :  { %p5705_p11 = pnand %p5704_p10, %p5698_p7 }
  0x53   :  { %5708 = shalt.err (!%p5705_p11)
}
  0x54   :  { %s5748_s2 = smov 64   ;;  %s5749_s3 = smov 4  }
  0x55   :  { %69 = dma.hbm_to_vmem [thread:$0]  %s6016_s4, 2048, %s64_s12, [#allocation9], %s5748_s2, %s5748_s2, %s5749_s3  }
  0x56   :  { %5731 = dma.done.wait [#allocation3], 18432  }
  0x57   :  { %5732 = vsyncadd [#allocation3], 4294948864 }
  0x58   :  { %5733 = dma.done.wait [#allocation6], 36896  }
  0x59   :  { %5734 = vsyncadd [#allocation6], 4294930400 }
  0x5a   :  { %5735 = dma.done.wait [#allocation9], 2080  }
  0x5b   :  { %5736 = vsyncadd [#allocation9], 4294965216  ;;  %v4935_v0 = vld [vmem:[#allocation5 + $0x4] ss:$8 sps:$4 sm:$0xff]   ;;  %v4939_v2 = vld [vmem:[#allocation5] ss:$8 sps:$4 sm:$0xff]  }
  0x5c   :  { %v4937_v1 = vld [vmem:[#allocation5 + $0x404] ss:$8 sps:$4 sm:$0xff]   ;;  %2678 = vmatprep.subr.bf16.mxu1 %v4935_v0  ;;  %v4940_v3 = vld [vmem:[#allocation5 + $0x400] ss:$8 sps:$4 sm:$0xff]   ;;  %v4941_v4 = vld [vmem:[#allocation5 + $0x14] ss:$8 sps:$4 sm:$0xff]  }
  0x5d   :  { %3130 = vmatprep.subr.bf16.mxu0 %v4937_v1  ;;  %2679 = vmatpush1.bf16.msra.mxu1 %v4939_v2  ;;  %v4943_v5 = vld [vmem:[#allocation5 + $0x414] ss:$8 sps:$4 sm:$0xff]   ;;  %v4945_v6 = vld [vmem:[#allocation5 + $0x10] ss:$8 sps:$4 sm:$0xff]   ;;  %v4947_v8 = vld [vmem:[#allocation5 + $0x24] ss:$8 sps:$4 sm:$0xff]  }
  0x5e   :  { %3131 = vmatpush1.bf16.msra.mxu0 %v4940_v3  ;;  %2680 = vmatprep.subr.bf16.mxu1 %v4941_v4  ;;  %v4946_v7 = vld [vmem:[#allocation5 + $0x410] ss:$8 sps:$4 sm:$0xff]   ;;  %v4949_v9 = vld [vmem:[#allocation5 + $0x424] ss:$8 sps:$4 sm:$0xff]   ;;  %v4951_v10 = vld [vmem:[#allocation5 + $0x20] ss:$8 sps:$4 sm:$0xff]  }
  0x5f   :  { %3132 = vmatprep.subr.bf16.mxu0 %v4943_v5  ;;  %v4952_v11 = vld [vmem:[#allocation5 + $0x420] ss:$8 sps:$4 sm:$0xff]   ;;  %v4953_v12 = vld [vmem:[#allocation5 + $0x34] ss:$8 sps:$4 sm:$0xff]   ;;  %v4957_v14 = vld [vmem:[#allocation5 + $0x30] ss:$8 sps:$4 sm:$0xff]  }
  0x60   :  { %v4955_v13 = vld [vmem:[#allocation5 + $0x434] ss:$8 sps:$4 sm:$0xff]   ;;  %v4958_v15 = vld [vmem:[#allocation5 + $0x430] ss:$8 sps:$4 sm:$0xff]   ;;  %v4959_v16 = vld [vmem:[#allocation5 + $0x44] ss:$8 sps:$4 sm:$0xff]  }
  0x61   :  { %2681 = vmatpush1.bf16.msra.mxu1 %v4945_v6  ;;  %v4961_v17 = vld [vmem:[#allocation5 + $0x444] ss:$8 sps:$4 sm:$0xff]   ;;  %v4963_v18 = vld [vmem:[#allocation5 + $0x40] ss:$8 sps:$4 sm:$0xff]   ;;  %v4965_v20 = vld [vmem:[#allocation5 + $0x54] ss:$8 sps:$4 sm:$0xff]  }
  0x62   :  { %3133 = vmatpush1.bf16.msra.mxu0 %v4946_v7  ;;  %2682 = vmatprep.subr.bf16.mxu1 %v4947_v8  ;;  %v4964_v19 = vld [vmem:[#allocation5 + $0x440] ss:$8 sps:$4 sm:$0xff]   ;;  %v4967_v21 = vld [vmem:[#allocation5 + $0x454] ss:$8 sps:$4 sm:$0xff]   ;;  %v4969_v22 = vld [vmem:[#allocation5 + $0x50] ss:$8 sps:$4 sm:$0xff]  }
  0x63   :  { %3134 = vmatprep.subr.bf16.mxu0 %v4949_v9  ;;  %v4970_v23 = vld [vmem:[#allocation5 + $0x450] ss:$8 sps:$4 sm:$0xff]   ;;  %v4971_v24 = vld [vmem:[#allocation5 + $0x64] ss:$8 sps:$4 sm:$0xff]   ;;  %v4975_v26 = vld [vmem:[#allocation5 + $0x60] ss:$8 sps:$4 sm:$0xff]  }
  0x64   :  { %v4973_v25 = vld [vmem:[#allocation5 + $0x464] ss:$8 sps:$4 sm:$0xff]   ;;  %v4976_v27 = vld [vmem:[#allocation5 + $0x460] ss:$8 sps:$4 sm:$0xff]   ;;  %v4977_v28 = vld [vmem:[#allocation5 + $0x74] ss:$8 sps:$4 sm:$0xff]  }
  0x65   :  { %2683 = vmatpush1.bf16.msra.mxu1 %v4951_v10  ;;  %v4979_v29 = vld [vmem:[#allocation5 + $0x474] ss:$8 sps:$4 sm:$0xff]   ;;  %v4981_v30 = vld [vmem:[#allocation5 + $0x70] ss:$8 sps:$4 sm:$0xff]   ;;  %v4983_v32 = vld [vmem:[#allocation5 + $0x84] ss:$8 sps:$4 sm:$0xff]  }
  0x66   :  { %3135 = vmatpush1.bf16.msra.mxu0 %v4952_v11  ;;  %2684 = vmatprep.subr.bf16.mxu1 %v4953_v12  ;;  %v4982_v31 = vld [vmem:[#allocation5 + $0x470] ss:$8 sps:$4 sm:$0xff]   ;;  %v4985_v33 = vld [vmem:[#allocation5 + $0x484] ss:$8 sps:$4 sm:$0xff]   ;;  %v4987_v34 = vld [vmem:[#allocation5 + $0x80] ss:$8 sps:$4 sm:$0xff]  }
  0x67   :  { %3136 = vmatprep.subr.bf16.mxu0 %v4955_v13  ;;  %v4988_v35 = vld [vmem:[#allocation5 + $0x480] ss:$8 sps:$4 sm:$0xff]   ;;  %v4989_v36 = vld [vmem:[#allocation5 + $0x94] ss:$8 sps:$4 sm:$0xff]   ;;  %v4993_v38 = vld [vmem:[#allocation5 + $0x90] ss:$8 sps:$4 sm:$0xff]  }
  0x68   :  { %v4991_v37 = vld [vmem:[#allocation5 + $0x494] ss:$8 sps:$4 sm:$0xff]   ;;  %v4994_v39 = vld [vmem:[#allocation5 + $0x490] ss:$8 sps:$4 sm:$0xff]   ;;  %v4995_v40 = vld [vmem:[#allocation5 + $0xa4] ss:$8 sps:$4 sm:$0xff]  }
  0x69   :  { %2685 = vmatpush1.bf16.msra.mxu1 %v4957_v14  ;;  %v4997_v41 = vld [vmem:[#allocation5 + $0x4a4] ss:$8 sps:$4 sm:$0xff]   ;;  %v4999_v42 = vld [vmem:[#allocation5 + $0xa0] ss:$8 sps:$4 sm:$0xff]   ;;  %v5001_v44 = vld [vmem:[#allocation5 + $0xb4] ss:$8 sps:$4 sm:$0xff]  }
  0x6a   :  { %3137 = vmatpush1.bf16.msra.mxu0 %v4958_v15  ;;  %2686 = vmatprep.subr.bf16.mxu1 %v4959_v16  ;;  %v5000_v43 = vld [vmem:[#allocation5 + $0x4a0] ss:$8 sps:$4 sm:$0xff]   ;;  %v5003_v45 = vld [vmem:[#allocation5 + $0x4b4] ss:$8 sps:$4 sm:$0xff]   ;;  %v5005_v46 = vld [vmem:[#allocation5 + $0xb0] ss:$8 sps:$4 sm:$0xff]  }
  0x6b   :  { %3138 = vmatprep.subr.bf16.mxu0 %v4961_v17  ;;  %v5006_v47 = vld [vmem:[#allocation5 + $0x4b0] ss:$8 sps:$4 sm:$0xff]   ;;  %v5007_v48 = vld [vmem:[#allocation5 + $0xc4] ss:$8 sps:$4 sm:$0xff]   ;;  %v5011_v52 = vld [vmem:[#allocation5 + $0xc0] ss:$8 sps:$4 sm:$0xff]  }
  0x6c   :  { %v5033_v49 = vld [vmem:[#allocation2 + $0x4] ss:$72 sps:$4 sm:$0xff]   ;;  %v5012_v53 = vld [vmem:[#allocation5 + $0x4c0] ss:$8 sps:$4 sm:$0xff]   ;;  %v5013_v54 = vld [vmem:[#allocation5 + $0xd4] ss:$8 sps:$4 sm:$0xff]  }
  0x6d   :  { %2687 = vmatpush1.bf16.msra.mxu1 %v4963_v18  ;;  %v5009_v50 = vld [vmem:[#allocation5 + $0x4c4] ss:$8 sps:$4 sm:$0xff]   ;;  %2710 = vmatprep.mubr.bf16.mxu1 %v5033_v49  ;;  %v5015_v55 = vld [vmem:[#allocation5 + $0x4d4] ss:$8 sps:$4 sm:$0xff]   ;;  %v5017_v56 = vld [vmem:[#allocation5 + $0xd0] ss:$8 sps:$4 sm:$0xff]  }
  0x6e   :  { %3139 = vmatpush1.bf16.msra.mxu0 %v4964_v19  ;;  %2688 = vmatprep.subr.bf16.mxu1 %v4965_v20  ;;  %v5036_v51 = vld [vmem:[#allocation2 + $0x24] ss:$72 sps:$4 sm:$0xff]   ;;  %v5018_v57 = vld [vmem:[#allocation5 + $0x4d0] ss:$8 sps:$4 sm:$0xff]   ;;  %v5023_v60 = vld [vmem:[#allocation5 + $0xe0] ss:$8 sps:$4 sm:$0xff]  }
  0x6f   :  { %3140 = vmatprep.subr.bf16.mxu0 %v4967_v21  ;;  %3162 = vmatprep.mubr.bf16.mxu0 %v5036_v51  ;;  %v5019_v58 = vld [vmem:[#allocation5 + $0xe4] ss:$8 sps:$4 sm:$0xff]   ;;  %v5024_v61 = vld [vmem:[#allocation5 + $0x4e0] ss:$8 sps:$4 sm:$0xff]   ;;  %v5025_v62 = vld [vmem:[#allocation5 + $0xf4] ss:$8 sps:$4 sm:$0xff]  }
  0x70   :  { %v5021_v59 = vld [vmem:[#allocation5 + $0x4e4] ss:$8 sps:$4 sm:$0xff]   ;;  %v5027_v63 = vld [vmem:[#allocation5 + $0x4f4] ss:$8 sps:$4 sm:$0xff]   ;;  %v5029_v0 = vld [vmem:[#allocation5 + $0xf0] ss:$8 sps:$4 sm:$0xff]  }
  0x71   :  { %2689 = vmatpush1.bf16.msra.mxu1 %v4969_v22  ;;  %v5030_v1 = vld [vmem:[#allocation5 + $0x4f0] ss:$8 sps:$4 sm:$0xff]   ;;  %v5039_v2 = vld [vmem:[#allocation5 + $0x104] ss:$8 sps:$4 sm:$0xff]   ;;  %v5031_v4 = vld [vmem:[#allocation2] ss:$72 sps:$4 sm:$0xff]  }
  0x72   :  { %3141 = vmatpush1.bf16.msra.mxu0 %v4970_v23  ;;  %2690 = vmatprep.subr.bf16.mxu1 %v4971_v24  ;;  %v5042_v3 = vld [vmem:[#allocation5 + $0x504] ss:$8 sps:$4 sm:$0xff]   ;;  %v5034_v5 = vld [vmem:[#allocation2 + $0x20] ss:$72 sps:$4 sm:$0xff]   ;;  %v5045_v8 = vld [vmem:[#allocation5 + $0x114] ss:$8 sps:$4 sm:$0xff]  }
  0x73   :  { %3142 = vmatprep.subr.bf16.mxu0 %v4973_v25  ;;  %v5037_v6 = vld [vmem:[#allocation5 + $0x100] ss:$8 sps:$4 sm:$0xff]   ;;  %v5048_v9 = vld [vmem:[#allocation5 + $0x514] ss:$8 sps:$4 sm:$0xff]   ;;  %v5043_v12 = vld [vmem:[#allocation5 + $0x110] ss:$8 sps:$4 sm:$0xff]  }
  0x74   :  { %v5040_v7 = vld [vmem:[#allocation5 + $0x500] ss:$8 sps:$4 sm:$0xff]   ;;  %v5049_v10 = vld [vmem:[#allocation2 + $0x94] ss:$72 sps:$4 sm:$0xff]   ;;  %v5046_v13 = vld [vmem:[#allocation5 + $0x510] ss:$8 sps:$4 sm:$0xff]  }
  0x75   :  { %2691 = vmatpush1.bf16.msra.mxu1 %v4975_v26  ;;  %v5051_v11 = vld [vmem:[#allocation2 + $0xb4] ss:$72 sps:$4 sm:$0xff]   ;;  %v5056_v14 = vld [vmem:[#allocation5 + $0x124] ss:$8 sps:$4 sm:$0xff]   ;;  %v5053_v16 = vld [vmem:[#allocation2 + $0x90] ss:$72 sps:$4 sm:$0xff]  }
  0x76   :  { %3143 = vmatpush1.bf16.msra.mxu0 %v4976_v27  ;;  %2692 = vmatprep.subr.bf16.mxu1 %v4977_v28  ;;  %v5060_v15 = vld [vmem:[#allocation5 + $0x524] ss:$8 sps:$4 sm:$0xff]   ;;  %v5054_v17 = vld [vmem:[#allocation5 + $0x120] ss:$8 sps:$4 sm:$0xff]   ;;  %v5057_v18 = vld [vmem:[#allocation2 + $0xb0] ss:$72 sps:$4 sm:$0xff]  }
  0x77   :  { %3144 = vmatprep.subr.bf16.mxu0 %v4979_v29  ;;  %v5058_v19 = vld [vmem:[#allocation5 + $0x520] ss:$8 sps:$4 sm:$0xff]   ;;  %v5063_v20 = vld [vmem:[#allocation5 + $0x134] ss:$8 sps:$4 sm:$0xff]   ;;  %v5067_v22 = vld [vmem:[#allocation2 + $0x124] ss:$72 sps:$4 sm:$0xff]  }
  0x78   :  { %v5066_v21 = vld [vmem:[#allocation5 + $0x534] ss:$8 sps:$4 sm:$0xff]   ;;  %v5069_v23 = vld [vmem:[#allocation2 + $0x144] ss:$72 sps:$4 sm:$0xff]   ;;  %v5061_v24 = vld [vmem:[#allocation5 + $0x130] ss:$8 sps:$4 sm:$0xff]  }
  0x79   :  { %2693 = vmatpush1.bf16.msra.mxu1 %v4981_v30  ;;  %v5064_v25 = vld [vmem:[#allocation5 + $0x530] ss:$8 sps:$4 sm:$0xff]   ;;  %v5074_v26 = vld [vmem:[#allocation5 + $0x144] ss:$8 sps:$4 sm:$0xff]   ;;  %v5071_v28 = vld [vmem:[#allocation2 + $0x120] ss:$72 sps:$4 sm:$0xff]  }
  0x7a   :  { %3145 = vmatpush1.bf16.msra.mxu0 %v4982_v31  ;;  %2694 = vmatprep.subr.bf16.mxu1 %v4983_v32  ;;  %v5078_v27 = vld [vmem:[#allocation5 + $0x544] ss:$8 sps:$4 sm:$0xff]   ;;  %v5072_v29 = vld [vmem:[#allocation5 + $0x140] ss:$8 sps:$4 sm:$0xff]   ;;  %v5081_v32 = vld [vmem:[#allocation5 + $0x154] ss:$8 sps:$4 sm:$0xff]  }
  0x7b   :  { %3146 = vmatprep.subr.bf16.mxu0 %v4985_v33  ;;  %v5075_v30 = vld [vmem:[#allocation2 + $0x140] ss:$72 sps:$4 sm:$0xff]   ;;  %v5084_v33 = vld [vmem:[#allocation5 + $0x554] ss:$8 sps:$4 sm:$0xff]   ;;  %v5100_v49 = vld [vmem:[#allocation5 + $0x570] ss:$8 sps:$4 sm:$0xff]  }
  0x7c   :  { %v5076_v31 = vld [vmem:[#allocation5 + $0x540] ss:$8 sps:$4 sm:$0xff]   ;;  %v5114_v51 = vld [vmem:[#allocation5 + $0x584] ss:$8 sps:$4 sm:$0xff]   ;;  %s5750_s4 = smov [#allocation11]  }
  0x7d   :  { %2695 = vmatpush1.bf16.msra.mxu1 %v4987_v34  ;;  %v5085_v34 = vld [vmem:[#allocation2 + $0x1b4] ss:$72 sps:$4 sm:$0xff]   ;;  %s4141_s7 = sshll.u32 %s5750_s4, 4  ;;  %s4142_s7 = int_to_ptr.vmem [resolvable:$true] %s4141_s7 }
  0x7e   :  { %3147 = vmatpush1.bf16.msra.mxu0 %v4988_v35  ;;  %2696 = vmatprep.subr.bf16.mxu1 %v4989_v36  ;;  %v5087_v35 = vld [vmem:[#allocation2 + $0x1d4] ss:$72 sps:$4 sm:$0xff]   ;;  %v5079_v36 = vld [vmem:[#allocation5 + $0x150] ss:$8 sps:$4 sm:$0xff]   ;;  %s5709_s8 = scalar_lea.vmem %s4142_s7, 2048  ;;  %p5714_p13 = scmp.lt.s32.totalorder %s4142_s7, %s4142_s7 }
  0x7f   :  { %3148 = vmatprep.subr.bf16.mxu0 %v4991_v37  ;;  %v5082_v37 = vld [vmem:[#allocation5 + $0x550] ss:$8 sps:$4 sm:$0xff]   ;;  %p5710_p12 = scmp.ne.s32.totalorder %s4142_s7, %s5709_s8  ;;  %p5715_p0 = scmp.lt.s32.totalorder %s5709_s8, %s5709_s8 }
  0x81   :  { %2697 = vmatpush1.bf16.msra.mxu1 %v4993_v38  ;;  %v5092_v38 = vld [vmem:[#allocation5 + $0x164] ss:$8 sps:$4 sm:$0xff]   ;;  %p5716_p1 = por %p5715_p0, %p5714_p13 }
  0x82   :  { %3149 = vmatpush1.bf16.msra.mxu0 %v4994_v39  ;;  %2698 = vmatprep.subr.bf16.mxu1 %v4995_v40  ;;  %v5096_v39 = vld [vmem:[#allocation5 + $0x564] ss:$8 sps:$4 sm:$0xff]   ;;  %v5089_v40 = vld [vmem:[#allocation2 + $0x1b0] ss:$72 sps:$4 sm:$0xff]  }
  0x83   :  { %3150 = vmatprep.subr.bf16.mxu0 %v4997_v41  ;;  %v5090_v41 = vld [vmem:[#allocation5 + $0x160] ss:$8 sps:$4 sm:$0xff]   ;;  %p5717_p2 = pnand %p5716_p1, %p5710_p12 }
  0x85   :  { %2699 = vmatpush1.bf16.msra.mxu1 %v4999_v42  ;;  %v5093_v42 = vld [vmem:[#allocation2 + $0x1d0] ss:$72 sps:$4 sm:$0xff]  }
  0x86   :  { %3151 = vmatpush1.bf16.msra.mxu0 %v5000_v43  ;;  %2700 = vmatprep.subr.bf16.mxu1 %v5001_v44  ;;  %v5094_v43 = vld [vmem:[#allocation5 + $0x560] ss:$8 sps:$4 sm:$0xff]   ;;  %v5099_v44 = vld [vmem:[#allocation5 + $0x174] ss:$8 sps:$4 sm:$0xff]  }
  0x87   :  { %3152 = vmatprep.subr.bf16.mxu0 %v5003_v45  ;;  %v5102_v45 = vld [vmem:[#allocation5 + $0x574] ss:$8 sps:$4 sm:$0xff]  }
  0x89   :  { %2701 = vmatpush1.bf16.msra.mxu1 %v5005_v46  ;;  %v5103_v46 = vld [vmem:[#allocation2 + $0x244] ss:$72 sps:$4 sm:$0xff]  }
  0x8a   :  { %3153 = vmatpush1.bf16.msra.mxu0 %v5006_v47  ;;  %2702 = vmatprep.subr.bf16.mxu1 %v5007_v48  ;;  %v5105_v47 = vld [vmem:[#allocation2 + $0x264] ss:$72 sps:$4 sm:$0xff]   ;;  %v5097_v48 = vld [vmem:[#allocation5 + $0x170] ss:$8 sps:$4 sm:$0xff]  }
  0x8b   :  { %3154 = vmatprep.subr.bf16.mxu0 %v5009_v50  ;;  %v5110_v50 = vld [vmem:[#allocation5 + $0x184] ss:$8 sps:$4 sm:$0xff]  }
  0x8d   :  { %2703 = vmatpush1.bf16.msra.mxu1 %v5011_v52  ;;  %v5107_v52 = vld [vmem:[#allocation2 + $0x240] ss:$72 sps:$4 sm:$0xff]  }
  0x8e   :  { %3155 = vmatpush1.bf16.msra.mxu0 %v5012_v53  ;;  %2704 = vmatprep.subr.bf16.mxu1 %v5013_v54  ;;  %v5108_v53 = vld [vmem:[#allocation5 + $0x180] ss:$8 sps:$4 sm:$0xff]  }
  0x8f   :  { %3156 = vmatprep.subr.bf16.mxu0 %v5015_v55  ;;  %v5111_v54 = vld [vmem:[#allocation2 + $0x260] ss:$72 sps:$4 sm:$0xff]  }
  0x90   :  { %v5112_v55 = vld [vmem:[#allocation5 + $0x580] ss:$8 sps:$4 sm:$0xff]  }
  0x91   :  { %2705 = vmatpush1.bf16.msra.mxu1 %v5017_v56  ;;  %v5117_v56 = vld [vmem:[#allocation5 + $0x194] ss:$8 sps:$4 sm:$0xff]  }
  0x92   :  { %3157 = vmatpush1.bf16.msra.mxu0 %v5018_v57  ;;  %2706 = vmatprep.subr.bf16.mxu1 %v5019_v58  ;;  %v5120_v57 = vld [vmem:[#allocation5 + $0x594] ss:$8 sps:$4 sm:$0xff]  }
  0x93   :  { %3158 = vmatprep.subr.bf16.mxu0 %v5021_v59  ;;  %v5121_v58 = vld [vmem:[#allocation2 + $0x2d4] ss:$72 sps:$4 sm:$0xff]  }
  0x94   :  { %v5123_v59 = vld [vmem:[#allocation2 + $0x2f4] ss:$72 sps:$4 sm:$0xff]  }
  0x95   :  { %2707 = vmatpush1.bf16.msra.mxu1 %v5023_v60  ;;  %v5115_v60 = vld [vmem:[#allocation5 + $0x190] ss:$8 sps:$4 sm:$0xff]  }
  0x96   :  { %3159 = vmatpush1.bf16.msra.mxu0 %v5024_v61  ;;  %2708 = vmatprep.subr.bf16.mxu1 %v5025_v62  ;;  %v5118_v61 = vld [vmem:[#allocation5 + $0x590] ss:$8 sps:$4 sm:$0xff]   ;;  %v5128_v62 = vld [vmem:[#allocation5 + $0x1a4] ss:$8 sps:$4 sm:$0xff]  }
  0x97   :  { %3160 = vmatprep.subr.bf16.mxu0 %v5027_v63  ;;  %v5132_v63 = vld [vmem:[#allocation5 + $0x5a4] ss:$8 sps:$4 sm:$0xff]  }
  0x99   :  { %2709 = vmatpush1.bf16.msra.mxu1 %v5029_v0  ;;  %v5125_v0 = vld [vmem:[#allocation2 + $0x2d0] ss:$72 sps:$4 sm:$0xff]  }
  0x9a   :  { %3161 = vmatpush1.bf16.msra.mxu0 %v5030_v1  ;;  %2791 = vmatprep.subr.bf16.mxu1 %v5039_v2  ;;  %v5126_v1 = vld [vmem:[#allocation5 + $0x1a0] ss:$8 sps:$4 sm:$0xff]   ;;  %v5129_v2 = vld [vmem:[#allocation2 + $0x2f0] ss:$72 sps:$4 sm:$0xff]  }
  0x9b   :  { %3243 = vmatprep.subr.bf16.mxu0 %v5042_v3  ;;  %v5130_v3 = vld [vmem:[#allocation5 + $0x5a0] ss:$8 sps:$4 sm:$0xff]  }
  0x9c   :  { %2711 = vmatmul.mubr.bf16.vlgmr.msra.gmra.mrb[0].mxu1 %v5031_v4  ;;  %v5135_v4 = vld [vmem:[#allocation5 + $0x1b4] ss:$8 sps:$4 sm:$0xff]  }
  0x9d   :  { %3163 = vmatmul.mubr.bf16.vlgmr.msra.gmra.mrb[0].mxu0 %v5034_v5  ;;  %2792 = vmatpush1.bf16.msra.mxu1 %v5037_v6  ;;  %v5138_v5 = vld [vmem:[#allocation5 + $0x5b4] ss:$8 sps:$4 sm:$0xff]   ;;  %v5139_v6 = vld [vmem:[#allocation2 + $0x364] ss:$72 sps:$4 sm:$0xff]  }
  0x9e   :  { %3244 = vmatpush1.bf16.msra.mxu0 %v5040_v7  ;;  %2793 = vmatprep.subr.bf16.mxu1 %v5045_v8  ;;  %v5141_v7 = vld [vmem:[#allocation2 + $0x384] ss:$72 sps:$4 sm:$0xff]   ;;  %v5133_v8 = vld [vmem:[#allocation5 + $0x1b0] ss:$8 sps:$4 sm:$0xff]  }
  0x9f   :  { %3245 = vmatprep.subr.bf16.mxu0 %v5048_v9  ;;  %2720 = vmatprep.mubr.bf16.mxu1 %v5049_v10  ;;  %v5136_v9 = vld [vmem:[#allocation5 + $0x5b0] ss:$8 sps:$4 sm:$0xff]   ;;  %v5146_v10 = vld [vmem:[#allocation5 + $0x1c4] ss:$8 sps:$4 sm:$0xff]  }
  0xa0   :  { %3172 = vmatprep.mubr.bf16.mxu0 %v5051_v11  ;;  %v5150_v11 = vld [vmem:[#allocation5 + $0x5c4] ss:$8 sps:$4 sm:$0xff]  }
  0xa1   :  { %2794 = vmatpush1.bf16.msra.mxu1 %v5043_v12  ;;  %v5143_v12 = vld [vmem:[#allocation2 + $0x360] ss:$72 sps:$4 sm:$0xff]  }
  0xa2   :  { %3246 = vmatpush1.bf16.msra.mxu0 %v5046_v13  ;;  %2795 = vmatprep.subr.bf16.mxu1 %v5056_v14  ;;  %v5144_v13 = vld [vmem:[#allocation5 + $0x1c0] ss:$8 sps:$4 sm:$0xff]  }
  0xa3   :  { %3247 = vmatprep.subr.bf16.mxu0 %v5060_v15  ;;  %v5147_v14 = vld [vmem:[#allocation2 + $0x380] ss:$72 sps:$4 sm:$0xff]  }
  0xa4   :  { %2721 = vmatmul.mubr.bf16.gmra.mrb[4].mxu1 %v5053_v16  ;;  %v5148_v15 = vld [vmem:[#allocation5 + $0x5c0] ss:$8 sps:$4 sm:$0xff]   ;;  %v5153_v16 = vld [vmem:[#allocation5 + $0x1d4] ss:$8 sps:$4 sm:$0xff]  }
  0xa5   :  { %3173 = vmatmul.mubr.bf16.gmra.mrb[4].mxu0 %v5057_v18  ;;  %2796 = vmatpush1.bf16.msra.mxu1 %v5054_v17  ;;  %v5156_v17 = vld [vmem:[#allocation5 + $0x5d4] ss:$8 sps:$4 sm:$0xff]  }
  0xa6   :  { %3248 = vmatpush1.bf16.msra.mxu0 %v5058_v19  ;;  %2797 = vmatprep.subr.bf16.mxu1 %v5063_v20  ;;  %v5157_v18 = vld [vmem:[#allocation2 + $0x3f4] ss:$72 sps:$4 sm:$0xff]   ;;  %v5151_v20 = vld [vmem:[#allocation5 + $0x1d0] ss:$8 sps:$4 sm:$0xff]  }
  0xa7   :  { %3249 = vmatprep.subr.bf16.mxu0 %v5066_v21  ;;  %2730 = vmatprep.mubr.bf16.mxu1 %v5067_v22  ;;  %v5159_v19 = vld [vmem:[#allocation2 + $0x414] ss:$72 sps:$4 sm:$0xff]   ;;  %v5154_v21 = vld [vmem:[#allocation5 + $0x5d0] ss:$8 sps:$4 sm:$0xff]   ;;  %v5164_v22 = vld [vmem:[#allocation5 + $0x1e4] ss:$8 sps:$4 sm:$0xff]  }
  0xa8   :  { %3182 = vmatprep.mubr.bf16.mxu0 %v5069_v23  ;;  %v5168_v23 = vld [vmem:[#allocation5 + $0x5e4] ss:$8 sps:$4 sm:$0xff]  }
  0xa9   :  { %2798 = vmatpush1.bf16.msra.mxu1 %v5061_v24  ;;  %v5161_v24 = vld [vmem:[#allocation2 + $0x3f0] ss:$72 sps:$4 sm:$0xff]  }
  0xaa   :  { %3250 = vmatpush1.bf16.msra.mxu0 %v5064_v25  ;;  %2799 = vmatprep.subr.bf16.mxu1 %v5074_v26  ;;  %v5162_v25 = vld [vmem:[#allocation5 + $0x1e0] ss:$8 sps:$4 sm:$0xff]   ;;  %v5165_v26 = vld [vmem:[#allocation2 + $0x410] ss:$72 sps:$4 sm:$0xff]  }
  0xab   :  { %3251 = vmatprep.subr.bf16.mxu0 %v5078_v27  ;;  %v5166_v27 = vld [vmem:[#allocation5 + $0x5e0] ss:$8 sps:$4 sm:$0xff]  }
  0xac   :  { %2731 = vmatmul.mubr.bf16.gmra.mrb[8].mxu1 %v5071_v28  ;;  %v5171_v28 = vld [vmem:[#allocation5 + $0x1f4] ss:$8 sps:$4 sm:$0xff]  }
  0xad   :  { %3183 = vmatmul.mubr.bf16.gmra.mrb[8].mxu0 %v5075_v30  ;;  %2800 = vmatpush1.bf16.msra.mxu1 %v5072_v29  ;;  %v5174_v29 = vld [vmem:[#allocation5 + $0x5f4] ss:$8 sps:$4 sm:$0xff]  }
  0xae   :  { %3252 = vmatpush1.bf16.msra.mxu0 %v5076_v31  ;;  %2801 = vmatprep.subr.bf16.mxu1 %v5081_v32  ;;  %v5177_v30 = vld [vmem:[#allocation2 + $0xc] ss:$72 sps:$4 sm:$0xff]   ;;  %v5169_v32 = vld [vmem:[#allocation5 + $0x1f0] ss:$8 sps:$4 sm:$0xff]  }
  0xaf   :  { %3253 = vmatprep.subr.bf16.mxu0 %v5084_v33  ;;  %2740 = vmatprep.mubr.bf16.mxu1 %v5085_v34  ;;  %v5180_v31 = vld [vmem:[#allocation2 + $0x2c] ss:$72 sps:$4 sm:$0xff]   ;;  %v5172_v33 = vld [vmem:[#allocation5 + $0x5f0] ss:$8 sps:$4 sm:$0xff]  }
  0xb0   :  { %3192 = vmatprep.mubr.bf16.mxu0 %v5087_v35  ;;  %v5183_v34 = vld [vmem:[#allocation5 + $0x204] ss:$8 sps:$4 sm:$0xff]  }
  0xb1   :  { %2802 = vmatpush1.bf16.msra.mxu1 %v5079_v36  ;;  %v5186_v35 = vld [vmem:[#allocation5 + $0x604] ss:$8 sps:$4 sm:$0xff]   ;;  %v5175_v36 = vld [vmem:[#allocation2 + $0x8] ss:$72 sps:$4 sm:$0xff]  }
  0xb2   :  { %3254 = vmatpush1.bf16.msra.mxu0 %v5082_v37  ;;  %2803 = vmatprep.subr.bf16.mxu1 %v5092_v38  ;;  %v5178_v37 = vld [vmem:[#allocation2 + $0x28] ss:$72 sps:$4 sm:$0xff]  }
  0xb3   :  { %3255 = vmatprep.subr.bf16.mxu0 %v5096_v39  ;;  %v5181_v38 = vld [vmem:[#allocation5 + $0x200] ss:$8 sps:$4 sm:$0xff]  }
  0xb4   :  { %2741 = vmatmul.mubr.bf16.gmra.mrb[12].mxu1 %v5089_v40  ;;  %v5184_v39 = vld [vmem:[#allocation5 + $0x600] ss:$8 sps:$4 sm:$0xff]   ;;  %v5189_v40 = vld [vmem:[#allocation5 + $0x214] ss:$8 sps:$4 sm:$0xff]  }
  0xb5   :  { %3193 = vmatmul.mubr.bf16.gmra.mrb[12].mxu0 %v5093_v42  ;;  %2804 = vmatpush1.bf16.msra.mxu1 %v5090_v41  ;;  %v5192_v41 = vld [vmem:[#allocation5 + $0x614] ss:$8 sps:$4 sm:$0xff]  }
  0xb6   :  { %3256 = vmatpush1.bf16.msra.mxu0 %v5094_v43  ;;  %2805 = vmatprep.subr.bf16.mxu1 %v5099_v44  ;;  %v5193_v42 = vld [vmem:[#allocation2 + $0x9c] ss:$72 sps:$4 sm:$0xff]   ;;  %v5187_v44 = vld [vmem:[#allocation5 + $0x210] ss:$8 sps:$4 sm:$0xff]  }
  0xb7   :  { %3257 = vmatprep.subr.bf16.mxu0 %v5102_v45  ;;  %2750 = vmatprep.mubr.bf16.mxu1 %v5103_v46  ;;  %v5195_v43 = vld [vmem:[#allocation2 + $0xbc] ss:$72 sps:$4 sm:$0xff]   ;;  %v5190_v45 = vld [vmem:[#allocation5 + $0x610] ss:$8 sps:$4 sm:$0xff]  }
  0xb8   :  { %3202 = vmatprep.mubr.bf16.mxu0 %v5105_v47  ;;  %v5200_v46 = vld [vmem:[#allocation5 + $0x224] ss:$8 sps:$4 sm:$0xff]  }
  0xb9   :  { %2806 = vmatpush1.bf16.msra.mxu1 %v5097_v48  ;;  %v5204_v47 = vld [vmem:[#allocation5 + $0x624] ss:$8 sps:$4 sm:$0xff]   ;;  %v5197_v48 = vld [vmem:[#allocation2 + $0x98] ss:$72 sps:$4 sm:$0xff]  }
  0xba   :  { %3258 = vmatpush1.bf16.msra.mxu0 %v5100_v49  ;;  %2807 = vmatprep.subr.bf16.mxu1 %v5110_v50  ;;  %v5198_v49 = vld [vmem:[#allocation5 + $0x220] ss:$8 sps:$4 sm:$0xff]  }
  0xbb   :  { %3259 = vmatprep.subr.bf16.mxu0 %v5114_v51  ;;  %v5201_v50 = vld [vmem:[#allocation2 + $0xb8] ss:$72 sps:$4 sm:$0xff]  }
  0xbc   :  { %2751 = vmatmul.mubr.bf16.gmra.mrb[16].mxu1 %v5107_v52  ;;  %v5202_v51 = vld [vmem:[#allocation5 + $0x620] ss:$8 sps:$4 sm:$0xff]   ;;  %v5207_v52 = vld [vmem:[#allocation5 + $0x234] ss:$8 sps:$4 sm:$0xff]  }
  0xbd   :  { %3203 = vmatmul.mubr.bf16.gmra.mrb[16].mxu0 %v5111_v54  ;;  %2808 = vmatpush1.bf16.msra.mxu1 %v5108_v53  ;;  %v5210_v53 = vld [vmem:[#allocation5 + $0x634] ss:$8 sps:$4 sm:$0xff]  }
  0xbe   :  { %3260 = vmatpush1.bf16.msra.mxu0 %v5112_v55  ;;  %2809 = vmatprep.subr.bf16.mxu1 %v5117_v56  ;;  %v5211_v54 = vld [vmem:[#allocation2 + $0x12c] ss:$72 sps:$4 sm:$0xff]   ;;  %v5205_v56 = vld [vmem:[#allocation5 + $0x230] ss:$8 sps:$4 sm:$0xff]  }
  0xbf   :  { %3261 = vmatprep.subr.bf16.mxu0 %v5120_v57  ;;  %2760 = vmatprep.mubr.bf16.mxu1 %v5121_v58  ;;  %v5213_v55 = vld [vmem:[#allocation2 + $0x14c] ss:$72 sps:$4 sm:$0xff]   ;;  %v5208_v57 = vld [vmem:[#allocation5 + $0x630] ss:$8 sps:$4 sm:$0xff]  }
  0xc0   :  { %3212 = vmatprep.mubr.bf16.mxu0 %v5123_v59  ;;  %v5218_v58 = vld [vmem:[#allocation5 + $0x244] ss:$8 sps:$4 sm:$0xff]  }
  0xc1   :  { %2810 = vmatpush1.bf16.msra.mxu1 %v5115_v60  ;;  %v5222_v59 = vld [vmem:[#allocation5 + $0x644] ss:$8 sps:$4 sm:$0xff]   ;;  %v5215_v60 = vld [vmem:[#allocation2 + $0x128] ss:$72 sps:$4 sm:$0xff]  }
  0xc2   :  { %3262 = vmatpush1.bf16.msra.mxu0 %v5118_v61  ;;  %2811 = vmatprep.subr.bf16.mxu1 %v5128_v62  ;;  %v5216_v61 = vld [vmem:[#allocation5 + $0x240] ss:$8 sps:$4 sm:$0xff]  }
  0xc3   :  { %3263 = vmatprep.subr.bf16.mxu0 %v5132_v63  ;;  %v5219_v62 = vld [vmem:[#allocation2 + $0x148] ss:$72 sps:$4 sm:$0xff]  }
  0xc4   :  { %2761 = vmatmul.mubr.bf16.gmra.mrb[20].mxu1 %v5125_v0  ;;  %v5220_v63 = vld [vmem:[#allocation5 + $0x640] ss:$8 sps:$4 sm:$0xff]   ;;  %v5225_v0 = vld [vmem:[#allocation5 + $0x254] ss:$8 sps:$4 sm:$0xff]  }
  0xc5   :  { %3213 = vmatmul.mubr.bf16.gmra.mrb[20].mxu0 %v5129_v2  ;;  %2812 = vmatpush1.bf16.msra.mxu1 %v5126_v1  ;;  %v5228_v1 = vld [vmem:[#allocation5 + $0x654] ss:$8 sps:$4 sm:$0xff]  }
  0xc6   :  { %3264 = vmatpush1.bf16.msra.mxu0 %v5130_v3  ;;  %2813 = vmatprep.subr.bf16.mxu1 %v5135_v4  ;;  %v5229_v2 = vld [vmem:[#allocation2 + $0x1bc] ss:$72 sps:$4 sm:$0xff]   ;;  %v5223_v4 = vld [vmem:[#allocation5 + $0x250] ss:$8 sps:$4 sm:$0xff]  }
  0xc7   :  { %3265 = vmatprep.subr.bf16.mxu0 %v5138_v5  ;;  %2770 = vmatprep.mubr.bf16.mxu1 %v5139_v6  ;;  %v5231_v3 = vld [vmem:[#allocation2 + $0x1dc] ss:$72 sps:$4 sm:$0xff]   ;;  %v5226_v5 = vld [vmem:[#allocation5 + $0x650] ss:$8 sps:$4 sm:$0xff]  }
  0xc8   :  { %3222 = vmatprep.mubr.bf16.mxu0 %v5141_v7  ;;  %v5236_v6 = vld [vmem:[#allocation5 + $0x264] ss:$8 sps:$4 sm:$0xff]  }
  0xc9   :  { %2814 = vmatpush1.bf16.msra.mxu1 %v5133_v8  ;;  %v5240_v7 = vld [vmem:[#allocation5 + $0x664] ss:$8 sps:$4 sm:$0xff]   ;;  %v5233_v8 = vld [vmem:[#allocation2 + $0x1b8] ss:$72 sps:$4 sm:$0xff]  }
  0xca   :  { %3266 = vmatpush1.bf16.msra.mxu0 %v5136_v9  ;;  %2815 = vmatprep.subr.bf16.mxu1 %v5146_v10  ;;  %v5234_v9 = vld [vmem:[#allocation5 + $0x260] ss:$8 sps:$4 sm:$0xff]  }
  0xcb   :  { %3267 = vmatprep.subr.bf16.mxu0 %v5150_v11  ;;  %v5237_v10 = vld [vmem:[#allocation2 + $0x1d8] ss:$72 sps:$4 sm:$0xff]  }
  0xcc   :  { %2771 = vmatmul.mubr.bf16.gmra.mrb[24].mxu1 %v5143_v12  ;;  %v5238_v11 = vld [vmem:[#allocation5 + $0x660] ss:$8 sps:$4 sm:$0xff]   ;;  %v5243_v12 = vld [vmem:[#allocation5 + $0x274] ss:$8 sps:$4 sm:$0xff]  }
  0xcd   :  { %3223 = vmatmul.mubr.bf16.gmra.mrb[24].mxu0 %v5147_v14  ;;  %2816 = vmatpush1.bf16.msra.mxu1 %v5144_v13  ;;  %v5246_v13 = vld [vmem:[#allocation5 + $0x674] ss:$8 sps:$4 sm:$0xff]  }
  0xce   :  { %3268 = vmatpush1.bf16.msra.mxu0 %v5148_v15  ;;  %2817 = vmatprep.subr.bf16.mxu1 %v5153_v16  ;;  %v5247_v14 = vld [vmem:[#allocation2 + $0x24c] ss:$72 sps:$4 sm:$0xff]   ;;  %v5241_v16 = vld [vmem:[#allocation5 + $0x270] ss:$8 sps:$4 sm:$0xff]  }
  0xcf   :  { %3269 = vmatprep.subr.bf16.mxu0 %v5156_v17  ;;  %2780 = vmatprep.mubr.bf16.mxu1 %v5157_v18  ;;  %v5249_v15 = vld [vmem:[#allocation2 + $0x26c] ss:$72 sps:$4 sm:$0xff]   ;;  %v5244_v17 = vld [vmem:[#allocation5 + $0x670] ss:$8 sps:$4 sm:$0xff]  }
  0xd0   :  { %3232 = vmatprep.mubr.bf16.mxu0 %v5159_v19  ;;  %v5254_v18 = vld [vmem:[#allocation5 + $0x284] ss:$8 sps:$4 sm:$0xff]  }
  0xd1   :  { %2818 = vmatpush1.bf16.msra.mxu1 %v5151_v20  ;;  %v5258_v19 = vld [vmem:[#allocation5 + $0x684] ss:$8 sps:$4 sm:$0xff]   ;;  %v5251_v20 = vld [vmem:[#allocation2 + $0x248] ss:$72 sps:$4 sm:$0xff]  }
  0xd2   :  { %3270 = vmatpush1.bf16.msra.mxu0 %v5154_v21  ;;  %2819 = vmatprep.subr.bf16.mxu1 %v5164_v22  ;;  %v5252_v21 = vld [vmem:[#allocation5 + $0x280] ss:$8 sps:$4 sm:$0xff]  }
  0xd3   :  { %3271 = vmatprep.subr.bf16.mxu0 %v5168_v23  ;;  %v5255_v22 = vld [vmem:[#allocation2 + $0x268] ss:$72 sps:$4 sm:$0xff]  }
  0xd4   :  { %2781 = vmatmul.mubr.bf16.gmra.mrb[28].mxu1 %v5161_v24  ;;  %v5256_v23 = vld [vmem:[#allocation5 + $0x680] ss:$8 sps:$4 sm:$0xff]   ;;  %v5261_v24 = vld [vmem:[#allocation5 + $0x294] ss:$8 sps:$4 sm:$0xff]  }
  0xd5   :  { %3233 = vmatmul.mubr.bf16.gmra.mrb[28].mxu0 %v5165_v26  ;;  %2820 = vmatpush1.bf16.msra.mxu1 %v5162_v25  ;;  %v5264_v25 = vld [vmem:[#allocation5 + $0x694] ss:$8 sps:$4 sm:$0xff]  }
  0xd6   :  { %3272 = vmatpush1.bf16.msra.mxu0 %v5166_v27  ;;  %2821 = vmatprep.subr.bf16.mxu1 %v5171_v28  ;;  %v5265_v26 = vld [vmem:[#allocation2 + $0x2dc] ss:$72 sps:$4 sm:$0xff]   ;;  %v5259_v28 = vld [vmem:[#allocation5 + $0x290] ss:$8 sps:$4 sm:$0xff]  }
  0xd7   :  { %3273 = vmatprep.subr.bf16.mxu0 %v5174_v29  ;;  %2823 = vmatprep.mubr.bf16.mxu1 %v5177_v30  ;;  %v5267_v27 = vld [vmem:[#allocation2 + $0x2fc] ss:$72 sps:$4 sm:$0xff]   ;;  %v5262_v29 = vld [vmem:[#allocation5 + $0x690] ss:$8 sps:$4 sm:$0xff]  }
  0xd8   :  { %3275 = vmatprep.mubr.bf16.mxu0 %v5180_v31  ;;  %v5272_v30 = vld [vmem:[#allocation5 + $0x2a4] ss:$8 sps:$4 sm:$0xff]  }
  0xd9   :  { %2822 = vmatpush1.bf16.msra.mxu1 %v5169_v32  ;;  %v5276_v31 = vld [vmem:[#allocation5 + $0x6a4] ss:$8 sps:$4 sm:$0xff]   ;;  %v5269_v32 = vld [vmem:[#allocation2 + $0x2d8] ss:$72 sps:$4 sm:$0xff]  }
  0xda   :  { %3274 = vmatpush1.bf16.msra.mxu0 %v5172_v33  ;;  %2904 = vmatprep.subr.bf16.mxu1 %v5183_v34  ;;  %v5270_v33 = vld [vmem:[#allocation5 + $0x2a0] ss:$8 sps:$4 sm:$0xff]  }
  0xdb   :  { %3356 = vmatprep.subr.bf16.mxu0 %v5186_v35  ;;  %v5273_v34 = vld [vmem:[#allocation2 + $0x2f8] ss:$72 sps:$4 sm:$0xff]  }
  0xdc   :  { %2824 = vmatmul.mubr.bf16.vlgmr.msra.gmra.mrb[0].mxu1 %v5175_v36  ;;  %v5274_v35 = vld [vmem:[#allocation5 + $0x6a0] ss:$8 sps:$4 sm:$0xff]   ;;  %v5279_v36 = vld [vmem:[#allocation5 + $0x2b4] ss:$8 sps:$4 sm:$0xff]  }
  0xdd   :  { %3276 = vmatmul.mubr.bf16.vlgmr.msra.gmra.mrb[0].mxu0 %v5178_v37  ;;  %2905 = vmatpush1.bf16.msra.mxu1 %v5181_v38  ;;  %v5282_v37 = vld [vmem:[#allocation5 + $0x6b4] ss:$8 sps:$4 sm:$0xff]  }
  0xde   :  { %3357 = vmatpush1.bf16.msra.mxu0 %v5184_v39  ;;  %2906 = vmatprep.subr.bf16.mxu1 %v5189_v40  ;;  %v5283_v38 = vld [vmem:[#allocation2 + $0x36c] ss:$72 sps:$4 sm:$0xff]   ;;  %v5277_v40 = vld [vmem:[#allocation5 + $0x2b0] ss:$8 sps:$4 sm:$0xff]  }
  0xdf   :  { %3358 = vmatprep.subr.bf16.mxu0 %v5192_v41  ;;  %2833 = vmatprep.mubr.bf16.mxu1 %v5193_v42  ;;  %v5285_v39 = vld [vmem:[#allocation2 + $0x38c] ss:$72 sps:$4 sm:$0xff]   ;;  %v5280_v41 = vld [vmem:[#allocation5 + $0x6b0] ss:$8 sps:$4 sm:$0xff]  }
  0xe0   :  { %3285 = vmatprep.mubr.bf16.mxu0 %v5195_v43  ;;  %v5290_v42 = vld [vmem:[#allocation5 + $0x2c4] ss:$8 sps:$4 sm:$0xff]  }
  0xe1   :  { %2907 = vmatpush1.bf16.msra.mxu1 %v5187_v44  ;;  %v5294_v43 = vld [vmem:[#allocation5 + $0x6c4] ss:$8 sps:$4 sm:$0xff]   ;;  %v5287_v44 = vld [vmem:[#allocation2 + $0x368] ss:$72 sps:$4 sm:$0xff]  }
  0xe2   :  { %3359 = vmatpush1.bf16.msra.mxu0 %v5190_v45  ;;  %2908 = vmatprep.subr.bf16.mxu1 %v5200_v46  ;;  %v5288_v45 = vld [vmem:[#allocation5 + $0x2c0] ss:$8 sps:$4 sm:$0xff]  }
  0xe3   :  { %3360 = vmatprep.subr.bf16.mxu0 %v5204_v47  ;;  %v5291_v46 = vld [vmem:[#allocation2 + $0x388] ss:$72 sps:$4 sm:$0xff]  }
  0xe4   :  { %2834 = vmatmul.mubr.bf16.gmra.mrb[4].mxu1 %v5197_v48  ;;  %v5292_v47 = vld [vmem:[#allocation5 + $0x6c0] ss:$8 sps:$4 sm:$0xff]   ;;  %v5297_v48 = vld [vmem:[#allocation5 + $0x2d4] ss:$8 sps:$4 sm:$0xff]  }
  0xe5   :  { %3286 = vmatmul.mubr.bf16.gmra.mrb[4].mxu0 %v5201_v50  ;;  %2909 = vmatpush1.bf16.msra.mxu1 %v5198_v49  ;;  %v5300_v49 = vld [vmem:[#allocation5 + $0x6d4] ss:$8 sps:$4 sm:$0xff]  }
  0xe6   :  { %3361 = vmatpush1.bf16.msra.mxu0 %v5202_v51  ;;  %2910 = vmatprep.subr.bf16.mxu1 %v5207_v52  ;;  %v5301_v50 = vld [vmem:[#allocation2 + $0x3fc] ss:$72 sps:$4 sm:$0xff]   ;;  %v5295_v52 = vld [vmem:[#allocation5 + $0x2d0] ss:$8 sps:$4 sm:$0xff]  }
  0xe7   :  { %3362 = vmatprep.subr.bf16.mxu0 %v5210_v53  ;;  %2843 = vmatprep.mubr.bf16.mxu1 %v5211_v54  ;;  %v5303_v51 = vld [vmem:[#allocation2 + $0x41c] ss:$72 sps:$4 sm:$0xff]   ;;  %v5298_v53 = vld [vmem:[#allocation5 + $0x6d0] ss:$8 sps:$4 sm:$0xff]  }
  0xe8   :  { %3295 = vmatprep.mubr.bf16.mxu0 %v5213_v55  ;;  %v5308_v54 = vld [vmem:[#allocation5 + $0x2e4] ss:$8 sps:$4 sm:$0xff]  }
  0xe9   :  { %2911 = vmatpush1.bf16.msra.mxu1 %v5205_v56  ;;  %v5312_v55 = vld [vmem:[#allocation5 + $0x6e4] ss:$8 sps:$4 sm:$0xff]   ;;  %v5305_v56 = vld [vmem:[#allocation2 + $0x3f8] ss:$72 sps:$4 sm:$0xff]  }
  0xea   :  { %3363 = vmatpush1.bf16.msra.mxu0 %v5208_v57  ;;  %2912 = vmatprep.subr.bf16.mxu1 %v5218_v58  ;;  %v5306_v57 = vld [vmem:[#allocation5 + $0x2e0] ss:$8 sps:$4 sm:$0xff]  }
  0xeb   :  { %3364 = vmatprep.subr.bf16.mxu0 %v5222_v59  ;;  %v5309_v58 = vld [vmem:[#allocation2 + $0x418] ss:$72 sps:$4 sm:$0xff]  }
  0xec   :  { %2844 = vmatmul.mubr.bf16.gmra.mrb[8].mxu1 %v5215_v60  ;;  %v5310_v59 = vld [vmem:[#allocation5 + $0x6e0] ss:$8 sps:$4 sm:$0xff]   ;;  %v5315_v60 = vld [vmem:[#allocation5 + $0x2f4] ss:$8 sps:$4 sm:$0xff]  }
  0xed   :  { %3296 = vmatmul.mubr.bf16.gmra.mrb[8].mxu0 %v5219_v62  ;;  %2913 = vmatpush1.bf16.msra.mxu1 %v5216_v61  ;;  %v5318_v61 = vld [vmem:[#allocation5 + $0x6f4] ss:$8 sps:$4 sm:$0xff]  }
  0xee   :  { %3365 = vmatpush1.bf16.msra.mxu0 %v5220_v63  ;;  %2914 = vmatprep.subr.bf16.mxu1 %v5225_v0  ;;  %v5321_v62 = vld [vmem:[#allocation2 + $0x14] ss:$72 sps:$4 sm:$0xff]   ;;  %v5313_v0 = vld [vmem:[#allocation5 + $0x2f0] ss:$8 sps:$4 sm:$0xff]  }
  0xef   :  { %3366 = vmatprep.subr.bf16.mxu0 %v5228_v1  ;;  %2853 = vmatprep.mubr.bf16.mxu1 %v5229_v2  ;;  %v5324_v63 = vld [vmem:[#allocation2 + $0x34] ss:$72 sps:$4 sm:$0xff]   ;;  %v5316_v1 = vld [vmem:[#allocation5 + $0x6f0] ss:$8 sps:$4 sm:$0xff]   ;;  %v5327_v2 = vld [vmem:[#allocation5 + $0x304] ss:$8 sps:$4 sm:$0xff]  }
  0xf0   :  { %3305 = vmatprep.mubr.bf16.mxu0 %v5231_v3  ;;  %v5330_v3 = vld [vmem:[#allocation5 + $0x704] ss:$8 sps:$4 sm:$0xff]  }
  0xf1   :  { %2915 = vmatpush1.bf16.msra.mxu1 %v5223_v4  ;;  %v5319_v4 = vld [vmem:[#allocation2 + $0x10] ss:$72 sps:$4 sm:$0xff]  }
  0xf2   :  { %3367 = vmatpush1.bf16.msra.mxu0 %v5226_v5  ;;  %2916 = vmatprep.subr.bf16.mxu1 %v5236_v6  ;;  %v5322_v5 = vld [vmem:[#allocation2 + $0x30] ss:$72 sps:$4 sm:$0xff]   ;;  %v5325_v6 = vld [vmem:[#allocation5 + $0x300] ss:$8 sps:$4 sm:$0xff]  }
  0xf3   :  { %3368 = vmatprep.subr.bf16.mxu0 %v5240_v7  ;;  %v5328_v7 = vld [vmem:[#allocation5 + $0x700] ss:$8 sps:$4 sm:$0xff]  }
  0xf4   :  { %2854 = vmatmul.mubr.bf16.gmra.mrb[12].mxu1 %v5233_v8  ;;  %v5333_v8 = vld [vmem:[#allocation5 + $0x314] ss:$8 sps:$4 sm:$0xff]  }
  0xf5   :  { %3306 = vmatmul.mubr.bf16.gmra.mrb[12].mxu0 %v5237_v10  ;;  %2917 = vmatpush1.bf16.msra.mxu1 %v5234_v9  ;;  %v5336_v9 = vld [vmem:[#allocation5 + $0x714] ss:$8 sps:$4 sm:$0xff]   ;;  %v5337_v10 = vld [vmem:[#allocation2 + $0xa4] ss:$72 sps:$4 sm:$0xff]  }
  0xf6   :  { %3369 = vmatpush1.bf16.msra.mxu0 %v5238_v11  ;;  %2918 = vmatprep.subr.bf16.mxu1 %v5243_v12  ;;  %v5339_v11 = vld [vmem:[#allocation2 + $0xc4] ss:$72 sps:$4 sm:$0xff]   ;;  %v5331_v12 = vld [vmem:[#allocation5 + $0x310] ss:$8 sps:$4 sm:$0xff]  }
  0xf7   :  { %3370 = vmatprep.subr.bf16.mxu0 %v5246_v13  ;;  %2863 = vmatprep.mubr.bf16.mxu1 %v5247_v14  ;;  %v5334_v13 = vld [vmem:[#allocation5 + $0x710] ss:$8 sps:$4 sm:$0xff]   ;;  %v5344_v14 = vld [vmem:[#allocation5 + $0x324] ss:$8 sps:$4 sm:$0xff]  }
  0xf8   :  { %3315 = vmatprep.mubr.bf16.mxu0 %v5249_v15  ;;  %v5348_v15 = vld [vmem:[#allocation5 + $0x724] ss:$8 sps:$4 sm:$0xff]  }
  0xf9   :  { %2919 = vmatpush1.bf16.msra.mxu1 %v5241_v16  ;;  %v5341_v16 = vld [vmem:[#allocation2 + $0xa0] ss:$72 sps:$4 sm:$0xff]  }
  0xfa   :  { %3371 = vmatpush1.bf16.msra.mxu0 %v5244_v17  ;;  %2920 = vmatprep.subr.bf16.mxu1 %v5254_v18  ;;  %v5342_v17 = vld [vmem:[#allocation5 + $0x320] ss:$8 sps:$4 sm:$0xff]  }
  0xfb   :  { %3372 = vmatprep.subr.bf16.mxu0 %v5258_v19  ;;  %v5345_v18 = vld [vmem:[#allocation2 + $0xc0] ss:$72 sps:$4 sm:$0xff]  }
  0xfc   :  { %2864 = vmatmul.mubr.bf16.gmra.mrb[16].mxu1 %v5251_v20  ;;  %v5346_v19 = vld [vmem:[#allocation5 + $0x720] ss:$8 sps:$4 sm:$0xff]   ;;  %v5351_v20 = vld [vmem:[#allocation5 + $0x334] ss:$8 sps:$4 sm:$0xff]  }
  0xfd   :  { %3316 = vmatmul.mubr.bf16.gmra.mrb[16].mxu0 %v5255_v22  ;;  %2921 = vmatpush1.bf16.msra.mxu1 %v5252_v21  ;;  %v5354_v21 = vld [vmem:[#allocation5 + $0x734] ss:$8 sps:$4 sm:$0xff]  }
  0xfe   :  { %3373 = vmatpush1.bf16.msra.mxu0 %v5256_v23  ;;  %2922 = vmatprep.subr.bf16.mxu1 %v5261_v24  ;;  %v5355_v22 = vld [vmem:[#allocation2 + $0x134] ss:$72 sps:$4 sm:$0xff]   ;;  %v5349_v24 = vld [vmem:[#allocation5 + $0x330] ss:$8 sps:$4 sm:$0xff]  }
  0xff   :  { %3374 = vmatprep.subr.bf16.mxu0 %v5264_v25  ;;  %2873 = vmatprep.mubr.bf16.mxu1 %v5265_v26  ;;  %v5357_v23 = vld [vmem:[#allocation2 + $0x154] ss:$72 sps:$4 sm:$0xff]   ;;  %v5352_v25 = vld [vmem:[#allocation5 + $0x730] ss:$8 sps:$4 sm:$0xff]   ;;  %v5362_v26 = vld [vmem:[#allocation5 + $0x344] ss:$8 sps:$4 sm:$0xff]  }
 0x100   :  { %3325 = vmatprep.mubr.bf16.mxu0 %v5267_v27  ;;  %v5366_v27 = vld [vmem:[#allocation5 + $0x744] ss:$8 sps:$4 sm:$0xff]  }
 0x101   :  { %2923 = vmatpush1.bf16.msra.mxu1 %v5259_v28  ;;  %v5359_v28 = vld [vmem:[#allocation2 + $0x130] ss:$72 sps:$4 sm:$0xff]  }
 0x102   :  { %3375 = vmatpush1.bf16.msra.mxu0 %v5262_v29  ;;  %2924 = vmatprep.subr.bf16.mxu1 %v5272_v30  ;;  %v5360_v29 = vld [vmem:[#allocation5 + $0x340] ss:$8 sps:$4 sm:$0xff]   ;;  %v5363_v30 = vld [vmem:[#allocation2 + $0x150] ss:$72 sps:$4 sm:$0xff]  }
 0x103   :  { %3376 = vmatprep.subr.bf16.mxu0 %v5276_v31  ;;  %v5364_v31 = vld [vmem:[#allocation5 + $0x740] ss:$8 sps:$4 sm:$0xff]  }
 0x104   :  { %2874 = vmatmul.mubr.bf16.gmra.mrb[20].mxu1 %v5269_v32  ;;  %v5369_v32 = vld [vmem:[#allocation5 + $0x354] ss:$8 sps:$4 sm:$0xff]  }
 0x105   :  { %3326 = vmatmul.mubr.bf16.gmra.mrb[20].mxu0 %v5273_v34  ;;  %2925 = vmatpush1.bf16.msra.mxu1 %v5270_v33  ;;  %v5372_v33 = vld [vmem:[#allocation5 + $0x754] ss:$8 sps:$4 sm:$0xff]   ;;  %v5373_v34 = vld [vmem:[#allocation2 + $0x1c4] ss:$72 sps:$4 sm:$0xff]  }
 0x106   :  { %3377 = vmatpush1.bf16.msra.mxu0 %v5274_v35  ;;  %2926 = vmatprep.subr.bf16.mxu1 %v5279_v36  ;;  %v5375_v35 = vld [vmem:[#allocation2 + $0x1e4] ss:$72 sps:$4 sm:$0xff]   ;;  %v5367_v36 = vld [vmem:[#allocation5 + $0x350] ss:$8 sps:$4 sm:$0xff]  }
 0x107   :  { %3378 = vmatprep.subr.bf16.mxu0 %v5282_v37  ;;  %2883 = vmatprep.mubr.bf16.mxu1 %v5283_v38  ;;  %v5370_v37 = vld [vmem:[#allocation5 + $0x750] ss:$8 sps:$4 sm:$0xff]   ;;  %v5380_v38 = vld [vmem:[#allocation5 + $0x364] ss:$8 sps:$4 sm:$0xff]  }
 0x108   :  { %3335 = vmatprep.mubr.bf16.mxu0 %v5285_v39  ;;  %v5384_v39 = vld [vmem:[#allocation5 + $0x764] ss:$8 sps:$4 sm:$0xff]  }
 0x109   :  { %2927 = vmatpush1.bf16.msra.mxu1 %v5277_v40  ;;  %v5377_v40 = vld [vmem:[#allocation2 + $0x1c0] ss:$72 sps:$4 sm:$0xff]  }
 0x10a   :  { %3379 = vmatpush1.bf16.msra.mxu0 %v5280_v41  ;;  %2928 = vmatprep.subr.bf16.mxu1 %v5290_v42  ;;  %v5378_v41 = vld [vmem:[#allocation5 + $0x360] ss:$8 sps:$4 sm:$0xff]  }
 0x10b   :  { %3380 = vmatprep.subr.bf16.mxu0 %v5294_v43  ;;  %v5381_v42 = vld [vmem:[#allocation2 + $0x1e0] ss:$72 sps:$4 sm:$0xff]  }
 0x10c   :  { %2884 = vmatmul.mubr.bf16.gmra.mrb[24].mxu1 %v5287_v44  ;;  %v5382_v43 = vld [vmem:[#allocation5 + $0x760] ss:$8 sps:$4 sm:$0xff]   ;;  %v5387_v44 = vld [vmem:[#allocation5 + $0x374] ss:$8 sps:$4 sm:$0xff]  }
 0x10d   :  { %3336 = vmatmul.mubr.bf16.gmra.mrb[24].mxu0 %v5291_v46  ;;  %2929 = vmatpush1.bf16.msra.mxu1 %v5288_v45  ;;  %v5390_v45 = vld [vmem:[#allocation5 + $0x774] ss:$8 sps:$4 sm:$0xff]  }
 0x10e   :  { %3381 = vmatpush1.bf16.msra.mxu0 %v5292_v47  ;;  %2930 = vmatprep.subr.bf16.mxu1 %v5297_v48  ;;  %v5391_v46 = vld [vmem:[#allocation2 + $0x254] ss:$72 sps:$4 sm:$0xff]   ;;  %v5385_v48 = vld [vmem:[#allocation5 + $0x370] ss:$8 sps:$4 sm:$0xff]  }
 0x10f   :  { %3382 = vmatprep.subr.bf16.mxu0 %v5300_v49  ;;  %2893 = vmatprep.mubr.bf16.mxu1 %v5301_v50  ;;  %v5393_v47 = vld [vmem:[#allocation2 + $0x274] ss:$72 sps:$4 sm:$0xff]   ;;  %v5388_v49 = vld [vmem:[#allocation5 + $0x770] ss:$8 sps:$4 sm:$0xff]   ;;  %v5398_v50 = vld [vmem:[#allocation5 + $0x384] ss:$8 sps:$4 sm:$0xff]  }
 0x110   :  { %3345 = vmatprep.mubr.bf16.mxu0 %v5303_v51  ;;  %v5402_v51 = vld [vmem:[#allocation5 + $0x784] ss:$8 sps:$4 sm:$0xff]  }
 0x111   :  { %2931 = vmatpush1.bf16.msra.mxu1 %v5295_v52  ;;  %v5395_v52 = vld [vmem:[#allocation2 + $0x250] ss:$72 sps:$4 sm:$0xff]  }
 0x112   :  { %3383 = vmatpush1.bf16.msra.mxu0 %v5298_v53  ;;  %2932 = vmatprep.subr.bf16.mxu1 %v5308_v54  ;;  %v5396_v53 = vld [vmem:[#allocation5 + $0x380] ss:$8 sps:$4 sm:$0xff]   ;;  %v5399_v54 = vld [vmem:[#allocation2 + $0x270] ss:$72 sps:$4 sm:$0xff]  }
 0x113   :  { %3384 = vmatprep.subr.bf16.mxu0 %v5312_v55  ;;  %v5400_v55 = vld [vmem:[#allocation5 + $0x780] ss:$8 sps:$4 sm:$0xff]  }
 0x114   :  { %2894 = vmatmul.mubr.bf16.gmra.mrb[28].mxu1 %v5305_v56  ;;  %v5405_v56 = vld [vmem:[#allocation5 + $0x394] ss:$8 sps:$4 sm:$0xff]  }
 0x115   :  { %3346 = vmatmul.mubr.bf16.gmra.mrb[28].mxu0 %v5309_v58  ;;  %2933 = vmatpush1.bf16.msra.mxu1 %v5306_v57  ;;  %v5408_v57 = vld [vmem:[#allocation5 + $0x794] ss:$8 sps:$4 sm:$0xff]   ;;  %v5409_v58 = vld [vmem:[#allocation2 + $0x2e4] ss:$72 sps:$4 sm:$0xff]  }
 0x116   :  { %3385 = vmatpush1.bf16.msra.mxu0 %v5310_v59  ;;  %2934 = vmatprep.subr.bf16.mxu1 %v5315_v60  ;;  %v5411_v59 = vld [vmem:[#allocation2 + $0x304] ss:$72 sps:$4 sm:$0xff]   ;;  %v5403_v60 = vld [vmem:[#allocation5 + $0x390] ss:$8 sps:$4 sm:$0xff]  }
 0x117   :  { %3386 = vmatprep.subr.bf16.mxu0 %v5318_v61  ;;  %2936 = vmatprep.mubr.bf16.mxu1 %v5321_v62  ;;  %v5406_v61 = vld [vmem:[#allocation5 + $0x790] ss:$8 sps:$4 sm:$0xff]   ;;  %v5416_v62 = vld [vmem:[#allocation5 + $0x3a4] ss:$8 sps:$4 sm:$0xff]  }
 0x118   :  { %3388 = vmatprep.mubr.bf16.mxu0 %v5324_v63  ;;  %v5420_v63 = vld [vmem:[#allocation5 + $0x7a4] ss:$8 sps:$4 sm:$0xff]  }
 0x119   :  { %2935 = vmatpush1.bf16.msra.mxu1 %v5313_v0  ;;  %v5413_v0 = vld [vmem:[#allocation2 + $0x2e0] ss:$72 sps:$4 sm:$0xff]  }
 0x11a   :  { %3387 = vmatpush1.bf16.msra.mxu0 %v5316_v1  ;;  %3017 = vmatprep.subr.bf16.mxu1 %v5327_v2  ;;  %v5414_v1 = vld [vmem:[#allocation5 + $0x3a0] ss:$8 sps:$4 sm:$0xff]  }
 0x11b   :  { %3469 = vmatprep.subr.bf16.mxu0 %v5330_v3  ;;  %v5417_v2 = vld [vmem:[#allocation2 + $0x300] ss:$72 sps:$4 sm:$0xff]  }
 0x11c   :  { %2937 = vmatmul.mubr.bf16.vlgmr.msra.gmra.mrb[0].mxu1 %v5319_v4  ;;  %v5418_v3 = vld [vmem:[#allocation5 + $0x7a0] ss:$8 sps:$4 sm:$0xff]   ;;  %v5423_v4 = vld [vmem:[#allocation5 + $0x3b4] ss:$8 sps:$4 sm:$0xff]  }
 0x11d   :  { %3389 = vmatmul.mubr.bf16.vlgmr.msra.gmra.mrb[0].mxu0 %v5322_v5  ;;  %3018 = vmatpush1.bf16.msra.mxu1 %v5325_v6  ;;  %v5426_v5 = vld [vmem:[#allocation5 + $0x7b4] ss:$8 sps:$4 sm:$0xff]  }
 0x11e   :  { %3470 = vmatpush1.bf16.msra.mxu0 %v5328_v7  ;;  %3019 = vmatprep.subr.bf16.mxu1 %v5333_v8  ;;  %v5427_v6 = vld [vmem:[#allocation2 + $0x374] ss:$72 sps:$4 sm:$0xff]   ;;  %v5421_v8 = vld [vmem:[#allocation5 + $0x3b0] ss:$8 sps:$4 sm:$0xff]  }
 0x11f   :  { %3471 = vmatprep.subr.bf16.mxu0 %v5336_v9  ;;  %2946 = vmatprep.mubr.bf16.mxu1 %v5337_v10  ;;  %v5429_v7 = vld [vmem:[#allocation2 + $0x394] ss:$72 sps:$4 sm:$0xff]   ;;  %v5424_v9 = vld [vmem:[#allocation5 + $0x7b0] ss:$8 sps:$4 sm:$0xff]   ;;  %v5434_v10 = vld [vmem:[#allocation5 + $0x3c4] ss:$8 sps:$4 sm:$0xff]  }
 0x120   :  { %3398 = vmatprep.mubr.bf16.mxu0 %v5339_v11  ;;  %v5438_v11 = vld [vmem:[#allocation5 + $0x7c4] ss:$8 sps:$4 sm:$0xff]  }
 0x121   :  { %3020 = vmatpush1.bf16.msra.mxu1 %v5331_v12  ;;  %v5431_v12 = vld [vmem:[#allocation2 + $0x370] ss:$72 sps:$4 sm:$0xff]  }
 0x122   :  { %3472 = vmatpush1.bf16.msra.mxu0 %v5334_v13  ;;  %3021 = vmatprep.subr.bf16.mxu1 %v5344_v14  ;;  %v5432_v13 = vld [vmem:[#allocation5 + $0x3c0] ss:$8 sps:$4 sm:$0xff]   ;;  %v5435_v14 = vld [vmem:[#allocation2 + $0x390] ss:$72 sps:$4 sm:$0xff]  }
 0x123   :  { %3473 = vmatprep.subr.bf16.mxu0 %v5348_v15  ;;  %v5436_v15 = vld [vmem:[#allocation5 + $0x7c0] ss:$8 sps:$4 sm:$0xff]  }
 0x124   :  { %2947 = vmatmul.mubr.bf16.gmra.mrb[4].mxu1 %v5341_v16  ;;  %v5441_v16 = vld [vmem:[#allocation5 + $0x3d4] ss:$8 sps:$4 sm:$0xff]  }
 0x125   :  { %3399 = vmatmul.mubr.bf16.gmra.mrb[4].mxu0 %v5345_v18  ;;  %3022 = vmatpush1.bf16.msra.mxu1 %v5342_v17  ;;  %v5444_v17 = vld [vmem:[#allocation5 + $0x7d4] ss:$8 sps:$4 sm:$0xff]   ;;  %v5445_v18 = vld [vmem:[#allocation2 + $0x404] ss:$72 sps:$4 sm:$0xff]  }
 0x126   :  { %3474 = vmatpush1.bf16.msra.mxu0 %v5346_v19  ;;  %3023 = vmatprep.subr.bf16.mxu1 %v5351_v20  ;;  %v5447_v19 = vld [vmem:[#allocation2 + $0x424] ss:$72 sps:$4 sm:$0xff]   ;;  %v5439_v20 = vld [vmem:[#allocation5 + $0x3d0] ss:$8 sps:$4 sm:$0xff]  }
 0x127   :  { %3475 = vmatprep.subr.bf16.mxu0 %v5354_v21  ;;  %2956 = vmatprep.mubr.bf16.mxu1 %v5355_v22  ;;  %v5442_v21 = vld [vmem:[#allocation5 + $0x7d0] ss:$8 sps:$4 sm:$0xff]   ;;  %v5452_v22 = vld [vmem:[#allocation5 + $0x3e4] ss:$8 sps:$4 sm:$0xff]  }
 0x128   :  { %3408 = vmatprep.mubr.bf16.mxu0 %v5357_v23  ;;  %v5456_v23 = vld [vmem:[#allocation5 + $0x7e4] ss:$8 sps:$4 sm:$0xff]  }
 0x129   :  { %3024 = vmatpush1.bf16.msra.mxu1 %v5349_v24  ;;  %v5449_v24 = vld [vmem:[#allocation2 + $0x400] ss:$72 sps:$4 sm:$0xff]  }
 0x12a   :  { %3476 = vmatpush1.bf16.msra.mxu0 %v5352_v25  ;;  %3025 = vmatprep.subr.bf16.mxu1 %v5362_v26  ;;  %v5450_v25 = vld [vmem:[#allocation5 + $0x3e0] ss:$8 sps:$4 sm:$0xff]  }
 0x12b   :  { %3477 = vmatprep.subr.bf16.mxu0 %v5366_v27  ;;  %v5453_v26 = vld [vmem:[#allocation2 + $0x420] ss:$72 sps:$4 sm:$0xff]  }
 0x12c   :  { %2957 = vmatmul.mubr.bf16.gmra.mrb[8].mxu1 %v5359_v28  ;;  %v5454_v27 = vld [vmem:[#allocation5 + $0x7e0] ss:$8 sps:$4 sm:$0xff]   ;;  %v5459_v28 = vld [vmem:[#allocation5 + $0x3f4] ss:$8 sps:$4 sm:$0xff]  }
 0x12d   :  { %3409 = vmatmul.mubr.bf16.gmra.mrb[8].mxu0 %v5363_v30  ;;  %3026 = vmatpush1.bf16.msra.mxu1 %v5360_v29  ;;  %v5462_v29 = vld [vmem:[#allocation5 + $0x7f4] ss:$8 sps:$4 sm:$0xff]  }
 0x12e   :  { %3478 = vmatpush1.bf16.msra.mxu0 %v5364_v31  ;;  %3027 = vmatprep.subr.bf16.mxu1 %v5369_v32  ;;  %v5465_v30 = vld [vmem:[#allocation2 + $0x1c] ss:$72 sps:$4 sm:$0xff]   ;;  %v5457_v32 = vld [vmem:[#allocation5 + $0x3f0] ss:$8 sps:$4 sm:$0xff]  }
 0x12f   :  { %3479 = vmatprep.subr.bf16.mxu0 %v5372_v33  ;;  %2966 = vmatprep.mubr.bf16.mxu1 %v5373_v34  ;;  %v5468_v31 = vld [vmem:[#allocation2 + $0x3c] ss:$72 sps:$4 sm:$0xff]   ;;  %v5460_v33 = vld [vmem:[#allocation5 + $0x7f0] ss:$8 sps:$4 sm:$0xff]  }
 0x130   :  { %3418 = vmatprep.mubr.bf16.mxu0 %v5375_v35  ;;  %v5471_v34 = vld [vmem:[#allocation5 + $0x804] ss:$8 sps:$4 sm:$0xff]   ;;  %v5463_v35 = vld [vmem:[#allocation2 + $0x18] ss:$72 sps:$4 sm:$0xff]  }
 0x131   :  { %3028 = vmatpush1.bf16.msra.mxu1 %v5367_v36  ;;  %v5466_v36 = vld [vmem:[#allocation2 + $0x38] ss:$72 sps:$4 sm:$0xff]  }
 0x132   :  { %3480 = vmatpush1.bf16.msra.mxu0 %v5370_v37  ;;  %3029 = vmatprep.subr.bf16.mxu1 %v5380_v38  ;;  %v5469_v37 = vld [vmem:[#allocation5 + $0x800] ss:$8 sps:$4 sm:$0xff]   ;;  %v5474_v38 = vld [vmem:[#allocation5 + $0x814] ss:$8 sps:$4 sm:$0xff]  }
 0x133   :  { %3481 = vmatprep.subr.bf16.mxu0 %v5384_v39  ;;  %v5475_v39 = vld [vmem:[#allocation2 + $0xac] ss:$72 sps:$4 sm:$0xff]  }
 0x134   :  { %2967 = vmatmul.mubr.bf16.gmra.mrb[12].mxu1 %v5377_v40  ;;  %v5477_v40 = vld [vmem:[#allocation2 + $0xcc] ss:$72 sps:$4 sm:$0xff]  }
 0x135   :  { %3419 = vmatmul.mubr.bf16.gmra.mrb[12].mxu0 %v5381_v42  ;;  %3030 = vmatpush1.bf16.msra.mxu1 %v5378_v41  ;;  %v5472_v41 = vld [vmem:[#allocation5 + $0x810] ss:$8 sps:$4 sm:$0xff]   ;;  %v5483_v42 = vld [vmem:[#allocation5 + $0x824] ss:$8 sps:$4 sm:$0xff]  }
 0x136   :  { %3482 = vmatpush1.bf16.msra.mxu0 %v5382_v43  ;;  %3031 = vmatprep.subr.bf16.mxu1 %v5387_v44  ;;  %v5479_v43 = vld [vmem:[#allocation2 + $0xa8] ss:$72 sps:$4 sm:$0xff]  }
 0x137   :  { %3483 = vmatprep.subr.bf16.mxu0 %v5390_v45  ;;  %2976 = vmatprep.mubr.bf16.mxu1 %v5391_v46  ;;  %v5480_v44 = vld [vmem:[#allocation2 + $0xc8] ss:$72 sps:$4 sm:$0xff]   ;;  %v5486_v46 = vld [vmem:[#allocation5 + $0x834] ss:$8 sps:$4 sm:$0xff]  }
 0x138   :  { %3428 = vmatprep.mubr.bf16.mxu0 %v5393_v47  ;;  %v5481_v45 = vld [vmem:[#allocation5 + $0x820] ss:$8 sps:$4 sm:$0xff]   ;;  %v5487_v47 = vld [vmem:[#allocation2 + $0x13c] ss:$72 sps:$4 sm:$0xff]  }
 0x139   :  { %3032 = vmatpush1.bf16.msra.mxu1 %v5385_v48  ;;  %v5489_v48 = vld [vmem:[#allocation2 + $0x15c] ss:$72 sps:$4 sm:$0xff]  }
 0x13a   :  { %3484 = vmatpush1.bf16.msra.mxu0 %v5388_v49  ;;  %3033 = vmatprep.subr.bf16.mxu1 %v5398_v50  ;;  %v5484_v49 = vld [vmem:[#allocation5 + $0x830] ss:$8 sps:$4 sm:$0xff]   ;;  %v5495_v50 = vld [vmem:[#allocation5 + $0x844] ss:$8 sps:$4 sm:$0xff]  }
 0x13b   :  { %3485 = vmatprep.subr.bf16.mxu0 %v5402_v51  ;;  %v5491_v51 = vld [vmem:[#allocation2 + $0x138] ss:$72 sps:$4 sm:$0xff]  }
 0x13c   :  { %2977 = vmatmul.mubr.bf16.gmra.mrb[16].mxu1 %v5395_v52  ;;  %v5492_v52 = vld [vmem:[#allocation2 + $0x158] ss:$72 sps:$4 sm:$0xff]  }
 0x13d   :  { %3429 = vmatmul.mubr.bf16.gmra.mrb[16].mxu0 %v5399_v54  ;;  %3034 = vmatpush1.bf16.msra.mxu1 %v5396_v53  ;;  %v5493_v53 = vld [vmem:[#allocation5 + $0x840] ss:$8 sps:$4 sm:$0xff]   ;;  %v5498_v54 = vld [vmem:[#allocation5 + $0x854] ss:$8 sps:$4 sm:$0xff]  }
 0x13e   :  { %3486 = vmatpush1.bf16.msra.mxu0 %v5400_v55  ;;  %3035 = vmatprep.subr.bf16.mxu1 %v5405_v56  ;;  %v5499_v55 = vld [vmem:[#allocation2 + $0x1cc] ss:$72 sps:$4 sm:$0xff]  }
 0x13f   :  { %3487 = vmatprep.subr.bf16.mxu0 %v5408_v57  ;;  %2986 = vmatprep.mubr.bf16.mxu1 %v5409_v58  ;;  %v5501_v56 = vld [vmem:[#allocation2 + $0x1ec] ss:$72 sps:$4 sm:$0xff]   ;;  %v5496_v57 = vld [vmem:[#allocation5 + $0x850] ss:$8 sps:$4 sm:$0xff]  }
 0x140   :  { %3438 = vmatprep.mubr.bf16.mxu0 %v5411_v59  ;;  %v5507_v58 = vld [vmem:[#allocation5 + $0x864] ss:$8 sps:$4 sm:$0xff]   ;;  %v5503_v59 = vld [vmem:[#allocation2 + $0x1c8] ss:$72 sps:$4 sm:$0xff]  }
 0x141   :  { %3036 = vmatpush1.bf16.msra.mxu1 %v5403_v60  ;;  %v5504_v60 = vld [vmem:[#allocation2 + $0x1e8] ss:$72 sps:$4 sm:$0xff]  }
 0x142   :  { %3488 = vmatpush1.bf16.msra.mxu0 %v5406_v61  ;;  %3037 = vmatprep.subr.bf16.mxu1 %v5416_v62  ;;  %v5505_v61 = vld [vmem:[#allocation5 + $0x860] ss:$8 sps:$4 sm:$0xff]   ;;  %v5510_v62 = vld [vmem:[#allocation5 + $0x874] ss:$8 sps:$4 sm:$0xff]  }
 0x143   :  { %3489 = vmatprep.subr.bf16.mxu0 %v5420_v63  ;;  %v5511_v63 = vld [vmem:[#allocation2 + $0x25c] ss:$72 sps:$4 sm:$0xff]  }
 0x144   :  { %2987 = vmatmul.mubr.bf16.gmra.mrb[20].mxu1 %v5413_v0  ;;  %v5513_v0 = vld [vmem:[#allocation2 + $0x27c] ss:$72 sps:$4 sm:$0xff]  }
 0x145   :  { %3439 = vmatmul.mubr.bf16.gmra.mrb[20].mxu0 %v5417_v2  ;;  %3038 = vmatpush1.bf16.msra.mxu1 %v5414_v1  ;;  %v5508_v1 = vld [vmem:[#allocation5 + $0x870] ss:$8 sps:$4 sm:$0xff]  }
 0x146   :  { %3490 = vmatpush1.bf16.msra.mxu0 %v5418_v3  ;;  %3039 = vmatprep.subr.bf16.mxu1 %v5423_v4  ;;  %v5515_v2 = vld [vmem:[#allocation2 + $0x258] ss:$72 sps:$4 sm:$0xff]   ;;  %v5519_v3 = vld [vmem:[#allocation5 + $0x884] ss:$8 sps:$4 sm:$0xff]  }
 0x147   :  { %3491 = vmatprep.subr.bf16.mxu0 %v5426_v5  ;;  %2996 = vmatprep.mubr.bf16.mxu1 %v5427_v6  ;;  %v5516_v4 = vld [vmem:[#allocation2 + $0x278] ss:$72 sps:$4 sm:$0xff]   ;;  %v5522_v6 = vld [vmem:[#allocation5 + $0x894] ss:$8 sps:$4 sm:$0xff]  }
 0x148   :  { %3448 = vmatprep.mubr.bf16.mxu0 %v5429_v7  ;;  %v5517_v5 = vld [vmem:[#allocation5 + $0x880] ss:$8 sps:$4 sm:$0xff]   ;;  %v5523_v7 = vld [vmem:[#allocation2 + $0x2ec] ss:$72 sps:$4 sm:$0xff]  }
 0x149   :  { %3040 = vmatpush1.bf16.msra.mxu1 %v5421_v8  ;;  %v5525_v8 = vld [vmem:[#allocation2 + $0x30c] ss:$72 sps:$4 sm:$0xff]  }
 0x14a   :  { %3492 = vmatpush1.bf16.msra.mxu0 %v5424_v9  ;;  %3041 = vmatprep.subr.bf16.mxu1 %v5434_v10  ;;  %v5520_v9 = vld [vmem:[#allocation5 + $0x890] ss:$8 sps:$4 sm:$0xff]   ;;  %v5531_v10 = vld [vmem:[#allocation5 + $0x8a4] ss:$8 sps:$4 sm:$0xff]  }
 0x14b   :  { %3493 = vmatprep.subr.bf16.mxu0 %v5438_v11  ;;  %v5527_v11 = vld [vmem:[#allocation2 + $0x2e8] ss:$72 sps:$4 sm:$0xff]  }
 0x14c   :  { %2997 = vmatmul.mubr.bf16.gmra.mrb[24].mxu1 %v5431_v12  ;;  %v5528_v12 = vld [vmem:[#allocation2 + $0x308] ss:$72 sps:$4 sm:$0xff]  }
 0x14d   :  { %3449 = vmatmul.mubr.bf16.gmra.mrb[24].mxu0 %v5435_v14  ;;  %3042 = vmatpush1.bf16.msra.mxu1 %v5432_v13  ;;  %v5529_v13 = vld [vmem:[#allocation5 + $0x8a0] ss:$8 sps:$4 sm:$0xff]   ;;  %v5535_v14 = vld [vmem:[#allocation2 + $0x37c] ss:$72 sps:$4 sm:$0xff]  }
 0x14e   :  { %3494 = vmatpush1.bf16.msra.mxu0 %v5436_v15  ;;  %3043 = vmatprep.subr.bf16.mxu1 %v5441_v16  ;;  %v5534_v15 = vld [vmem:[#allocation5 + $0x8b4] ss:$8 sps:$4 sm:$0xff]  }
 0x14f   :  { %3495 = vmatprep.subr.bf16.mxu0 %v5444_v17  ;;  %3006 = vmatprep.mubr.bf16.mxu1 %v5445_v18  ;;  %v5537_v16 = vld [vmem:[#allocation2 + $0x39c] ss:$72 sps:$4 sm:$0xff]   ;;  %v5532_v17 = vld [vmem:[#allocation5 + $0x8b0] ss:$8 sps:$4 sm:$0xff]  }
 0x150   :  { %3458 = vmatprep.mubr.bf16.mxu0 %v5447_v19  ;;  %v5543_v18 = vld [vmem:[#allocation5 + $0x8c4] ss:$8 sps:$4 sm:$0xff]   ;;  %v5539_v19 = vld [vmem:[#allocation2 + $0x378] ss:$72 sps:$4 sm:$0xff]  }
 0x151   :  { %3044 = vmatpush1.bf16.msra.mxu1 %v5439_v20  ;;  %v5540_v20 = vld [vmem:[#allocation2 + $0x398] ss:$72 sps:$4 sm:$0xff]  }
 0x152   :  { %3496 = vmatpush1.bf16.msra.mxu0 %v5442_v21  ;;  %3045 = vmatprep.subr.bf16.mxu1 %v5452_v22  ;;  %v5541_v21 = vld [vmem:[#allocation5 + $0x8c0] ss:$8 sps:$4 sm:$0xff]   ;;  %v5547_v22 = vld [vmem:[#allocation2 + $0x40c] ss:$72 sps:$4 sm:$0xff]  }
 0x153   :  { %3497 = vmatprep.subr.bf16.mxu0 %v5456_v23  ;;  %v5546_v23 = vld [vmem:[#allocation5 + $0x8d4] ss:$8 sps:$4 sm:$0xff]  }
 0x154   :  { %3007 = vmatmul.mubr.bf16.gmra.mrb[28].mxu1 %v5449_v24  ;;  %v5549_v24 = vld [vmem:[#allocation2 + $0x42c] ss:$72 sps:$4 sm:$0xff]  }
 0x155   :  { %3459 = vmatmul.mubr.bf16.gmra.mrb[28].mxu0 %v5453_v26  ;;  %3046 = vmatpush1.bf16.msra.mxu1 %v5450_v25  ;;  %v5544_v25 = vld [vmem:[#allocation5 + $0x8d0] ss:$8 sps:$4 sm:$0xff]   ;;  %v5555_v26 = vld [vmem:[#allocation5 + $0x8e4] ss:$8 sps:$4 sm:$0xff]  }
 0x156   :  { %3498 = vmatpush1.bf16.msra.mxu0 %v5454_v27  ;;  %3047 = vmatprep.subr.bf16.mxu1 %v5459_v28  ;;  %v5551_v27 = vld [vmem:[#allocation2 + $0x408] ss:$72 sps:$4 sm:$0xff]  }
 0x157   :  { %3499 = vmatprep.subr.bf16.mxu0 %v5462_v29  ;;  %3049 = vmatprep.mubr.bf16.mxu1 %v5465_v30  ;;  %v5552_v28 = vld [vmem:[#allocation2 + $0x428] ss:$72 sps:$4 sm:$0xff]   ;;  %v5561_v30 = vld [vmem:[#allocation2 + $0x44] ss:$72 sps:$4 sm:$0xff]  }
 0x158   :  { %3501 = vmatprep.mubr.bf16.mxu0 %v5468_v31  ;;  %v5553_v29 = vld [vmem:[#allocation5 + $0x8e0] ss:$8 sps:$4 sm:$0xff]   ;;  %v5558_v31 = vld [vmem:[#allocation5 + $0x8f4] ss:$8 sps:$4 sm:$0xff]  }
 0x159   :  { %3048 = vmatpush1.bf16.msra.mxu1 %v5457_v32  ;;  %v5556_v32 = vld [vmem:[#allocation5 + $0x8f0] ss:$8 sps:$4 sm:$0xff]  }
 0x15a   :  { %3500 = vmatpush1.bf16.msra.mxu0 %v5460_v33  ;;  %v5559_v33 = vld [vmem:[#allocation2 + $0x40] ss:$72 sps:$4 sm:$0xff]  }
 0x15b   :  { %3582 = vmatprep.subr.bf16.mxu0 %v5471_v34  ;;  %v5562_v34 = vld [vmem:[#allocation2 + $0xd4] ss:$72 sps:$4 sm:$0xff]  }
 0x15c   :  { %3050 = vmatmul.mubr.bf16.vlgmr.msra.gmra.mrb[0].mxu1 %v5463_v35  ;;  %v5564_v35 = vld [vmem:[#allocation2 + $0xd0] ss:$72 sps:$4 sm:$0xff]  }
 0x15d   :  { %3502 = vmatmul.mubr.bf16.vlgmr.msra.gmra.mrb[0].mxu0 %v5466_v36  ;;  %3059 = vmatprep.mubr.bf16.mxu1 %v5475_v39  ;;  %v5565_v36 = vld [vmem:[#allocation2 + $0x164] ss:$72 sps:$4 sm:$0xff]   ;;  %v5570_v39 = vld [vmem:[#allocation2 + $0x1f0] ss:$72 sps:$4 sm:$0xff]  }
 0x15e   :  { %3583 = vmatpush1.bf16.msra.mxu0 %v5469_v37  ;;  %3511 = vmatprep.mubr.bf16.mxu0 %v5477_v40  ;;  %v5567_v37 = vld [vmem:[#allocation2 + $0x160] ss:$72 sps:$4 sm:$0xff]   ;;  %v5571_v40 = vld [vmem:[#allocation2 + $0x284] ss:$72 sps:$4 sm:$0xff]  }
 0x15f   :  { %3584 = vmatprep.subr.bf16.mxu0 %v5474_v38  ;;  %v5568_v38 = vld [vmem:[#allocation2 + $0x1f4] ss:$72 sps:$4 sm:$0xff]  }
 0x162   :  { %3585 = vmatpush1.bf16.msra.mxu0 %v5472_v41  ;;  %v5573_v41 = vld [vmem:[#allocation2 + $0x280] ss:$72 sps:$4 sm:$0xff]  }
 0x163   :  { %3586 = vmatprep.subr.bf16.mxu0 %v5483_v42  ;;  %v5574_v42 = vld [vmem:[#allocation2 + $0x314] ss:$72 sps:$4 sm:$0xff]  }
 0x164   :  { %3060 = vmatmul.mubr.bf16.gmra.mrb[4].mxu1 %v5479_v43  ;;  %v5583_v43 = vld [vmem:[#allocation10 + $0x40] sm:$0xff]  }
 0x165   :  { %3512 = vmatmul.mubr.bf16.gmra.mrb[4].mxu0 %v5480_v44  ;;  %3069 = vmatprep.mubr.bf16.mxu1 %v5487_v47  ;;  %v5576_v44 = vld [vmem:[#allocation2 + $0x310] ss:$72 sps:$4 sm:$0xff]  }
 0x166   :  { %3587 = vmatpush1.bf16.msra.mxu0 %v5481_v45  ;;  %3521 = vmatprep.mubr.bf16.mxu0 %v5489_v48  ;;  %v5584_v45 = vld [vmem:[#allocation10] sm:$0xff]   ;;  %v5585_v47 = vld [vmem:[#allocation10 + $0x48] sm:$0xff]  }
 0x167   :  { %3588 = vmatprep.subr.bf16.mxu0 %v5486_v46  ;;  %v5577_v46 = vld [vmem:[#allocation2 + $0x3a4] ss:$72 sps:$4 sm:$0xff]   ;;  %4603 = vmatprep.subr.bf16.mxu1 %v5583_v43  ;;  %v5579_v48 = vld [vmem:[#allocation2 + $0x3a0] ss:$72 sps:$4 sm:$0xff]  }
 0x168   :  { %4604 = vmatpush3.bf16.msra.mxu1 %v5584_v45 }
 0x169   :  { %4605 = vmatprep.subr.bf16.mxu1 %v5585_v47 }
 0x16a   :  { %3589 = vmatpush1.bf16.msra.mxu0 %v5484_v49  ;;  %v5586_v49 = vld [vmem:[#allocation10 + $0x8] sm:$0xff]  }
 0x16b   :  { %3590 = vmatprep.subr.bf16.mxu0 %v5495_v50  ;;  %v5580_v50 = vld [vmem:[#allocation2 + $0x434] ss:$72 sps:$4 sm:$0xff]  }
 0x16c   :  { %3070 = vmatmul.mubr.bf16.gmra.mrb[8].mxu1 %v5491_v51  ;;  %v5587_v51 = vld [vmem:[#allocation10 + $0x50] sm:$0xff]  }
 0x16d   :  { %3522 = vmatmul.mubr.bf16.gmra.mrb[8].mxu0 %v5492_v52  ;;  %3079 = vmatprep.mubr.bf16.mxu1 %v5499_v55  ;;  %v5582_v52 = vld [vmem:[#allocation2 + $0x430] ss:$72 sps:$4 sm:$0xff]   ;;  %v5590_v55 = vld [vmem:[#allocation10 + $0x18] sm:$0xff]  }
 0x16e   :  { %3591 = vmatpush1.bf16.msra.mxu0 %v5493_v53  ;;  %3531 = vmatprep.mubr.bf16.mxu0 %v5501_v56  ;;  %v5588_v53 = vld [vmem:[#allocation10 + $0x10] sm:$0xff]   ;;  %v5591_v56 = vld [vmem:[#allocation10 + $0x60] sm:$0xff]  }
 0x16f   :  { %3592 = vmatprep.subr.bf16.mxu0 %v5498_v54  ;;  %4606 = vmatpush3.bf16.msra.mxu1 %v5586_v49  ;;  %v5589_v54 = vld [vmem:[#allocation10 + $0x58] sm:$0xff]  }
 0x170   :  { %4607 = vmatprep.subr.bf16.mxu1 %v5587_v51 }
 0x172   :  { %3593 = vmatpush1.bf16.msra.mxu0 %v5496_v57  ;;  %v5592_v57 = vld [vmem:[#allocation10 + $0x20] sm:$0xff]  }
 0x173   :  { %3594 = vmatprep.subr.bf16.mxu0 %v5507_v58  ;;  %4608 = vmatpush3.bf16.msra.mxu1 %v5588_v53  ;;  %v5593_v58 = vld [vmem:[#allocation10 + $0x68] sm:$0xff]  }
 0x174   :  { %3080 = vmatmul.mubr.bf16.gmra.mrb[12].mxu1 %v5503_v59  ;;  %4609 = vmatprep.subr.bf16.mxu1 %v5589_v54  ;;  %v5594_v59 = vld [vmem:[#allocation10 + $0x28] sm:$0xff]  }
 0x175   :  { %3532 = vmatmul.mubr.bf16.gmra.mrb[12].mxu0 %v5504_v60  ;;  %3089 = vmatprep.mubr.bf16.mxu1 %v5511_v63  ;;  %v5595_v60 = vld [vmem:[#allocation10 + $0x70] sm:$0xff]   ;;  %v5598_v63 = vld [vmem:[#allocation10 + $0x38] sm:$0xff]  }
 0x176   :  { %3595 = vmatpush1.bf16.msra.mxu0 %v5505_v61  ;;  %3541 = vmatprep.mubr.bf16.mxu0 %v5513_v0  ;;  %v5596_v61 = vld [vmem:[#allocation10 + $0x30] sm:$0xff]  }
 0x177   :  { %3596 = vmatprep.subr.bf16.mxu0 %v5510_v62  ;;  %4610 = vmatpush3.bf16.msra.mxu1 %v5590_v55  ;;  %v5597_v62 = vld [vmem:[#allocation10 + $0x78] sm:$0xff]  }
 0x178   :  { %4611 = vmatprep.subr.bf16.mxu1 %v5591_v56 }
 0x17a   :  { %3597 = vmatpush1.bf16.msra.mxu0 %v5508_v1 }
 0x17b   :  { %3598 = vmatprep.subr.bf16.mxu0 %v5519_v3  ;;  %4612 = vmatpush3.bf16.msra.mxu1 %v5592_v57 }
 0x17c   :  { %3090 = vmatmul.mubr.bf16.gmra.mrb[16].mxu1 %v5515_v2  ;;  %4613 = vmatprep.subr.bf16.mxu1 %v5593_v58 }
 0x17d   :  { %3542 = vmatmul.mubr.bf16.gmra.mrb[16].mxu0 %v5516_v4  ;;  %3099 = vmatprep.mubr.bf16.mxu1 %v5523_v7 }
 0x17e   :  { %3599 = vmatpush1.bf16.msra.mxu0 %v5517_v5  ;;  %3551 = vmatprep.mubr.bf16.mxu0 %v5525_v8 }
 0x17f   :  { %3600 = vmatprep.subr.bf16.mxu0 %v5522_v6  ;;  %4614 = vmatpush3.bf16.msra.mxu1 %v5594_v59 }
 0x180   :  { %4615 = vmatprep.subr.bf16.mxu1 %v5595_v60 }
 0x182   :  { %3601 = vmatpush1.bf16.msra.mxu0 %v5520_v9 }
 0x183   :  { %3602 = vmatprep.subr.bf16.mxu0 %v5531_v10  ;;  %4616 = vmatpush3.bf16.msra.mxu1 %v5596_v61 }
 0x184   :  { %3100 = vmatmul.mubr.bf16.gmra.mrb[20].mxu1 %v5527_v11  ;;  %4617 = vmatprep.subr.bf16.mxu1 %v5597_v62 }
 0x185   :  { %3552 = vmatmul.mubr.bf16.gmra.mrb[20].mxu0 %v5528_v12  ;;  %3109 = vmatprep.mubr.bf16.mxu1 %v5535_v14 }
 0x186   :  { %3603 = vmatpush1.bf16.msra.mxu0 %v5529_v13  ;;  %3561 = vmatprep.mubr.bf16.mxu0 %v5537_v16 }
 0x187   :  { %3604 = vmatprep.subr.bf16.mxu0 %v5534_v15  ;;  %4618 = vmatpush3.bf16.msra.mxu1 %v5598_v63 }
 0x18a   :  { %3605 = vmatpush1.bf16.msra.mxu0 %v5532_v17 }
 0x18b   :  { %3606 = vmatprep.subr.bf16.mxu0 %v5543_v18 }
 0x18c   :  { %3110 = vmatmul.mubr.bf16.gmra.mrb[24].mxu1 %v5539_v19 }
 0x18d   :  { %3562 = vmatmul.mubr.bf16.gmra.mrb[24].mxu0 %v5540_v20  ;;  %3119 = vmatprep.mubr.bf16.mxu1 %v5547_v22 }
 0x18e   :  { %3607 = vmatpush1.bf16.msra.mxu0 %v5541_v21  ;;  %3571 = vmatprep.mubr.bf16.mxu0 %v5549_v24 }
 0x18f   :  { %3608 = vmatprep.subr.bf16.mxu0 %v5546_v23 }
 0x192   :  { %3609 = vmatpush1.bf16.msra.mxu0 %v5544_v25 }
 0x193   :  { %3610 = vmatprep.subr.bf16.mxu0 %v5555_v26 }
 0x194   :  { %3120 = vmatmul.mubr.bf16.gmra.mrb[28].mxu1 %v5551_v27 }
 0x195   :  { %3572 = vmatmul.mubr.bf16.gmra.mrb[28].mxu0 %v5552_v28  ;;  %v3697_v28 = vlaneseq }
 0x196   :  { %3611 = vmatpush1.bf16.msra.mxu0 %v5553_v29  ;;  %3614 = vmatprep.mubr.bf16.mxu0 %v5561_v30 }
 0x197   :  { %3612 = vmatprep.subr.bf16.mxu0 %v5558_v31  ;;  %v3698_v29 = vshrl.u32 %v3697_v28, 7 }
 0x19a   :  { %3613 = vmatpush1.bf16.msra.mxu0 %v5556_v32 }
 0x19d   :  { %3615 = vmatmul.mubr.bf16.vlgmr.msra.gmra.mrb[0].mxu0 %v5559_v33 }
 0x19e   :  { %3624 = vmatprep.mubr.bf16.mxu0 %v5562_v34  ;;  %v3699_v34 = vsub.s32 0, %v3698_v29 }
 0x1a5   :  { %3625 = vmatmul.mubr.bf16.gmra.mrb[4].mxu0 %v5564_v35  ;;  %v3695_v35 = vld [vmem:[#allocation7] sm:$0x3] }
 0x1a6   :  { %3634 = vmatprep.mubr.bf16.mxu0 %v5565_v36  ;;  %v3703_v36 = vsub.s32 1, %v3698_v29 }
 0x1ad   :  { %3635 = vmatmul.mubr.bf16.gmra.mrb[8].mxu0 %v5567_v37  ;;  %v3739_v37 = vld [vmem:[#allocation8] sm:$0x3] }
 0x1ae   :  { %3644 = vmatprep.mubr.bf16.mxu0 %v5568_v38  ;;  %v5898_v38 = vrot.slane %v3695_v35, %v3699_v34  ;;  %v5904_v45 = vrot.slane %v3739_v37, %v3703_v36 }
 0x1b5   :  { %3645 = vmatmul.mubr.bf16.gmra.mrb[12].mxu0 %v5570_v39 }
 0x1b6   :  { %3654 = vmatprep.mubr.bf16.mxu0 %v5571_v40  ;;  %v5900_v40 = vrot.slane %v3695_v35, %v3703_v36 }
 0x1bd   :  { %3655 = vmatmul.mubr.bf16.gmra.mrb[16].mxu0 %v5573_v41 }
 0x1be   :  { %3664 = vmatprep.mubr.bf16.mxu0 %v5574_v42  ;;  %v5902_v42 = vrot.slane %v3739_v37, %v3699_v34 }
 0x1c5   :  { %3665 = vmatmul.mubr.bf16.gmra.mrb[20].mxu0 %v5576_v44 }
 0x1c6   :  { %3674 = vmatprep.mubr.bf16.mxu0 %v5577_v46 }
 0x1cd   :  { %3675 = vmatmul.mubr.bf16.gmra.mrb[24].mxu0 %v5579_v48 }
 0x1ce   :  { %3684 = vmatprep.mubr.bf16.mxu0 %v5580_v50 }
 0x1d5   :  { %3685 = vmatmul.mubr.bf16.gmra.mrb[28].mxu0 %v5582_v52 }
 0x22f   :  { %v3051_v0 = vpop.f32.mrb[0].mxu1 }
 0x230   :  { %v3053_v1 = vpop.f32.mrb[1].mxu1 }
 0x231   :  { %v3055_v2 = vpop.f32.mrb[2].mxu1 }
 0x232   :  { %v3057_v3 = vpop.f32.mrb[3].mxu1 }
 0x237   :  { %v3061_v4 = vpop.f32.mrb[4].mxu1 }
 0x238   :  { %v5844_v5 = vpop.f32.mrb[5].mxu1 }
 0x239   :  { %v5846_v6 = vpop.f32.mrb[6].mxu1 }
 0x23a   :  { %v5848_v7 = vpop.f32.mrb[7].mxu1 }
 0x23f   :  { %v5850_v8 = vpop.f32.mrb[8].mxu1 }
 0x240   :  { %v5852_v9 = vpop.f32.mrb[9].mxu1 }
 0x241   :  { %v5854_v10 = vpop.f32.mrb[10].mxu1 }
 0x242   :  { %v5856_v11 = vpop.f32.mrb[11].mxu1 }
 0x247   :  { %v5858_v12 = vpop.f32.mrb[12].mxu1 }
 0x248   :  { %v5860_v13 = vpop.f32.mrb[13].mxu1 }
 0x249   :  { %v5862_v14 = vpop.f32.mrb[14].mxu1 }
 0x24a   :  { %v5864_v15 = vpop.f32.mrb[15].mxu1 }
 0x24f   :  { %v5866_v16 = vpop.f32.mrb[16].mxu1 }
 0x250   :  { %v5868_v17 = vpop.f32.mrb[17].mxu1 }
 0x251   :  { %v5870_v18 = vpop.f32.mrb[18].mxu1 }
 0x252   :  { %v5872_v19 = vpop.f32.mrb[19].mxu1 }
 0x257   :  { %v5874_v20 = vpop.f32.mrb[20].mxu1 }
 0x258   :  { %v5876_v21 = vpop.f32.mrb[21].mxu1 }
 0x259   :  { %v5878_v22 = vpop.f32.mrb[22].mxu1 }
 0x25a   :  { %v5880_v23 = vpop.f32.mrb[23].mxu1 }
 0x25f   :  { %v5882_v24 = vpop.f32.mrb[24].mxu1 }
 0x260   :  { %v5884_v25 = vpop.f32.mrb[25].mxu1 }
 0x261   :  { %v5886_v26 = vpop.f32.mrb[26].mxu1 }
 0x262   :  { %v5888_v27 = vpop.f32.mrb[27].mxu1 }
 0x267   :  { %v5890_v30 = vpop.f32.mrb[28].mxu1 }
 0x268   :  { %v5892_v31 = vpop.f32.mrb[29].mxu1 }
 0x269   :  { %v5894_v32 = vpop.f32.mrb[30].mxu1 }
 0x26a   :  { %v5896_v33 = vpop.f32.mrb[31].mxu1 }
 0x270   :  { %v3616_v39 = vpop.f32.mrb[0].mxu0 }
 0x271   :  { %v4667_v41 = vadd.f32 %v3616_v39, %v3051_v0  ;;  %v3618_v43 = vpop.f32.mrb[1].mxu0 }
 0x272   :  { %v4668_v44 = vadd.f32 %v3618_v43, %v3053_v1  ;;  %v3620_v46 = vpop.f32.mrb[2].mxu0 }
 0x273   :  { %v3707_v47 = vmul.f32 %v4667_v41, %v5898_v38  ;;  %v4669_v48 = vadd.f32 %v3620_v46, %v3055_v2  ;;  %v3622_v49 = vpop.f32.mrb[3].mxu0 }
 0x274   :  { %v3708_v50 = vmul.f32 %v4668_v44, %v5900_v40  ;;  %v4670_v51 = vadd.f32 %v3622_v49, %v3057_v3 }
 0x275   :  { %v3751_v52 = vadd.f32 %v5902_v42, %v3707_v47  ;;  %v3709_v53 = vmul.f32 %v4669_v48, %v5898_v38 }
 0x276   :  { %v3752_v54 = vadd.f32 %v5904_v45, %v3708_v50  ;;  %v3710_v55 = vmul.f32 %v4670_v51, %v5900_v40 }
 0x277   :  { %vm3783_vm0 = vcmp.gt.f32.partialorder %v3751_v52, 0.0  ;;  %v3815_v56 = vmul.f32 0.01, %v3751_v52  ;;  %v3753_v57 = vadd.f32 %v5902_v42, %v3709_v53 }
 0x278   :  { %v3816_v58 = vmul.f32 0.01, %v3752_v54  ;;  %v3754_v59 = vadd.f32 %v5904_v45, %v3710_v55  ;;  %v3626_v60 = vpop.f32.mrb[4].mxu0  ;;  %vm3784_vm1 = vcmp.gt.f32.partialorder %v3752_v54, 0.0 }
 0x279   :  { %vm3785_vm2 = vcmp.gt.f32.partialorder %v3753_v57, 0.0  ;;  %v3817_v61 = vmul.f32 0.01, %v3753_v57  ;;  %v4671_v62 = vadd.f32 %v3626_v60, %v3061_v4  ;;  %v3628_v63 = vpop.f32.mrb[5].mxu0  ;;  %v3847_v0 = vsel %vm3783_vm0, %v3751_v52, %v3815_v56 }
 0x27a   :  { %v3818_v1 = vmul.f32 0.01, %v3754_v59  ;;  %v4672_v2 = vadd.f32 %v3628_v63, %v5844_v5  ;;  %v3630_v3 = vpop.f32.mrb[6].mxu0  ;;  %vm3786_vm3 = vcmp.gt.f32.partialorder %v3754_v59, 0.0  ;;  %v3848_v36 = vsel %vm3784_vm1, %v3752_v54, %v3816_v58 }
 0x27b   :  { %v3849_v28 = vsel %vm3785_vm2, %v3753_v57, %v3817_v61  ;;  %v3711_v29 = vmul.f32 %v4671_v62, %v5898_v38  ;;  %v4673_v34 = vadd.f32 %v3630_v3, %v5846_v6  ;;  %v3632_v35 = vpop.f32.mrb[7].mxu0 }
 0x27c   :  { %v3879_v37 = vpack.c.bf16 %v3849_v28, %v3847_v0  ;;  %v3712_v39 = vmul.f32 %v4672_v2, %v5900_v40  ;;  %v4674_v41 = vadd.f32 %v3632_v35, %v5848_v7  ;;  %v3850_v4 = vsel %vm3786_vm3, %v3754_v59, %v3818_v1 }
 0x27d   :  { %v3755_v43 = vadd.f32 %v5902_v42, %v3711_v29  ;;  %v3713_v44 = vmul.f32 %v4673_v34, %v5898_v38  ;;  %v3880_v5 = vpack.c.bf16 %v3850_v4, %v3848_v36 }
 0x27e   :  { %v3756_v46 = vadd.f32 %v5904_v45, %v3712_v39  ;;  %v3714_v47 = vmul.f32 %v4674_v41, %v5900_v40 }
 0x27f   :  { %v3819_v48 = vmul.f32 0.01, %v3755_v43  ;;  %v3757_v6 = vadd.f32 %v5902_v42, %v3713_v44  ;;  %4055 = vmatprep.mubr.bf16.mxu1 %v3880_v5  ;;  %vm3787_vm4 = vcmp.gt.f32.partialorder %v3755_v43, 0.0 }
 0x280   :  { %v3820_v49 = vmul.f32 0.01, %v3756_v46  ;;  %v3758_v50 = vadd.f32 %v5904_v45, %v3714_v47  ;;  %v3636_v51 = vpop.f32.mrb[8].mxu0  ;;  %4056 = vmatmul.mubr.bf16.vlgmr.msra.gmra.mrb[32].mxu1 %v3879_v37  ;;  %vm3788_vm5 = vcmp.gt.f32.partialorder %v3756_v46, 0.0 }
 0x281   :  { %v3821_v7 = vmul.f32 0.01, %v3757_v6  ;;  %v4675_v52 = vadd.f32 %v3636_v51, %v5850_v8  ;;  %v3638_v53 = vpop.f32.mrb[9].mxu0  ;;  %vm3789_vm6 = vcmp.gt.f32.partialorder %v3757_v6, 0.0  ;;  %v3851_v57 = vsel %vm3787_vm4, %v3755_v43, %v3819_v48 }
 0x282   :  { %v3822_v54 = vmul.f32 0.01, %v3758_v50  ;;  %v4676_v55 = vadd.f32 %v3638_v53, %v5852_v9  ;;  %v3640_v56 = vpop.f32.mrb[10].mxu0  ;;  %vm3790_vm7 = vcmp.gt.f32.partialorder %v3758_v50, 0.0  ;;  %v3852_v61 = vsel %vm3788_vm5, %v3756_v46, %v3820_v49 }
 0x283   :  { %v3715_v58 = vmul.f32 %v4675_v52, %v5898_v38  ;;  %v4677_v59 = vadd.f32 %v3640_v56, %v5854_v10  ;;  %v3642_v60 = vpop.f32.mrb[11].mxu0  ;;  %v3853_v62 = vsel %vm3789_vm6, %v3757_v6, %v3821_v7 }
 0x284   :  { %v3716_v63 = vmul.f32 %v4676_v55, %v5900_v40  ;;  %v4678_v0 = vadd.f32 %v3642_v60, %v5856_v11  ;;  %v3854_v8 = vsel %vm3790_vm7, %v3758_v50, %v3822_v54  ;;  %v3881_v1 = vpack.c.bf16 %v3853_v62, %v3851_v57 }
 0x285   :  { %v3759_v2 = vadd.f32 %v5902_v42, %v3715_v58  ;;  %v3717_v9 = vmul.f32 %v4677_v59, %v5898_v38  ;;  %v3882_v3 = vpack.c.bf16 %v3854_v8, %v3852_v61 }
 0x286   :  { %v3760_v28 = vadd.f32 %v5904_v45, %v3716_v63  ;;  %v3718_v29 = vmul.f32 %v4678_v0, %v5900_v40 }
 0x287   :  { %v3823_v34 = vmul.f32 0.01, %v3759_v2  ;;  %v3761_v10 = vadd.f32 %v5902_v42, %v3717_v9  ;;  %4063 = vmatprep.mubr.bf16.mxu1 %v3882_v3  ;;  %vm3791_vm8 = vcmp.gt.f32.partialorder %v3759_v2, 0.0 }
 0x288   :  { %v3824_v35 = vmul.f32 0.01, %v3760_v28  ;;  %v3762_v36 = vadd.f32 %v5904_v45, %v3718_v29  ;;  %v3646_v11 = vpop.f32.mrb[12].mxu0  ;;  %4064 = vmatmul.mubr.bf16.gmra.mrb[36].mxu1 %v3881_v1  ;;  %vm3792_vm9 = vcmp.gt.f32.partialorder %v3760_v28, 0.0 }
 0x289   :  { %v3825_v37 = vmul.f32 0.01, %v3761_v10  ;;  %v4679_v39 = vadd.f32 %v3646_v11, %v5858_v12  ;;  %v3648_v41 = vpop.f32.mrb[13].mxu0  ;;  %vm3793_vm10 = vcmp.gt.f32.partialorder %v3761_v10, 0.0  ;;  %v3855_v5 = vsel %vm3791_vm8, %v3759_v2, %v3823_v34 }
 0x28a   :  { %v3826_v4 = vmul.f32 0.01, %v3762_v36  ;;  %v4680_v43 = vadd.f32 %v3648_v41, %v5860_v13  ;;  %v3650_v44 = vpop.f32.mrb[14].mxu0  ;;  %vm3794_vm11 = vcmp.gt.f32.partialorder %v3762_v36, 0.0  ;;  %v3856_v6 = vsel %vm3792_vm9, %v3760_v28, %v3824_v35 }
 0x28b   :  { %v3719_v46 = vmul.f32 %v4679_v39, %v5898_v38  ;;  %v4681_v47 = vadd.f32 %v3650_v44, %v5862_v14  ;;  %v3652_v48 = vpop.f32.mrb[15].mxu0  ;;  %v3857_v49 = vsel %vm3793_vm10, %v3761_v10, %v3825_v37 }
 0x28c   :  { %v3720_v50 = vmul.f32 %v4680_v43, %v5900_v40  ;;  %v4682_v51 = vadd.f32 %v3652_v48, %v5864_v15  ;;  %v3858_v12 = vsel %vm3794_vm11, %v3762_v36, %v3826_v4  ;;  %v3883_v7 = vpack.c.bf16 %v3857_v49, %v3855_v5 }
 0x28d   :  { %v3763_v52 = vadd.f32 %v5902_v42, %v3719_v46  ;;  %v3721_v13 = vmul.f32 %v4681_v47, %v5898_v38  ;;  %v3884_v53 = vpack.c.bf16 %v3858_v12, %v3856_v6 }
 0x28e   :  { %v3764_v54 = vadd.f32 %v5904_v45, %v3720_v50  ;;  %v3722_v55 = vmul.f32 %v4682_v51, %v5900_v40 }
 0x28f   :  { %v3827_v56 = vmul.f32 0.01, %v3763_v52  ;;  %v3765_v14 = vadd.f32 %v5902_v42, %v3721_v13  ;;  %4071 = vmatprep.mubr.bf16.mxu1 %v3884_v53  ;;  %vm3795_vm12 = vcmp.gt.f32.partialorder %v3763_v52, 0.0 }
 0x290   :  { %v3828_v57 = vmul.f32 0.01, %v3764_v54  ;;  %v3766_v58 = vadd.f32 %v5904_v45, %v3722_v55  ;;  %v3656_v15 = vpop.f32.mrb[16].mxu0  ;;  %4072 = vmatmul.mubr.bf16.gmra.mrb[40].mxu1 %v3883_v7  ;;  %vm3796_vm13 = vcmp.gt.f32.partialorder %v3764_v54, 0.0 }
 0x291   :  { %v3829_v59 = vmul.f32 0.01, %v3765_v14  ;;  %v4683_v60 = vadd.f32 %v3656_v15, %v5866_v16  ;;  %v3658_v61 = vpop.f32.mrb[17].mxu0  ;;  %vm3797_vm14 = vcmp.gt.f32.partialorder %v3765_v14, 0.0  ;;  %v3859_v8 = vsel %vm3795_vm12, %v3763_v52, %v3827_v56 }
 0x292   :  { %v3830_v62 = vmul.f32 0.01, %v3766_v58  ;;  %v4684_v63 = vadd.f32 %v3658_v61, %v5868_v17  ;;  %v3660_v0 = vpop.f32.mrb[18].mxu0  ;;  %vm3798_vm15 = vcmp.gt.f32.partialorder %v3766_v58, 0.0  ;;  %v3860_v3 = vsel %vm3796_vm13, %v3764_v54, %v3828_v57 }
 0x293   :  { %v3723_v1 = vmul.f32 %v4683_v60, %v5898_v38  ;;  %v4685_v2 = vadd.f32 %v3660_v0, %v5870_v18  ;;  %v3662_v9 = vpop.f32.mrb[19].mxu0  ;;  %v3861_v28 = vsel %vm3797_vm14, %v3765_v14, %v3829_v59 }
 0x294   :  { %v3724_v29 = vmul.f32 %v4684_v63, %v5900_v40  ;;  %v4686_v34 = vadd.f32 %v3662_v9, %v5872_v19  ;;  %v3862_v16 = vsel %vm3798_vm15, %v3766_v58, %v3830_v62  ;;  %v3885_v10 = vpack.c.bf16 %v3861_v28, %v3859_v8 }
 0x295   :  { %v3767_v35 = vadd.f32 %v5902_v42, %v3723_v1  ;;  %v3725_v17 = vmul.f32 %v4685_v2, %v5898_v38  ;;  %v3886_v36 = vpack.c.bf16 %v3862_v16, %v3860_v3 }
 0x296   :  { %v3768_v11 = vadd.f32 %v5904_v45, %v3724_v29  ;;  %v3726_v37 = vmul.f32 %v4686_v34, %v5900_v40 }
 0x297   :  { %v3831_v39 = vmul.f32 0.01, %v3767_v35  ;;  %v3769_v18 = vadd.f32 %v5902_v42, %v3725_v17  ;;  %4079 = vmatprep.mubr.bf16.mxu1 %v3886_v36  ;;  %vm3799_vm0 = vcmp.gt.f32.partialorder %v3767_v35, 0.0 }
 0x298   :  { %v3832_v41 = vmul.f32 0.01, %v3768_v11  ;;  %v3770_v4 = vadd.f32 %v5904_v45, %v3726_v37  ;;  %v3666_v19 = vpop.f32.mrb[20].mxu0  ;;  %4080 = vmatmul.mubr.bf16.gmra.mrb[44].mxu1 %v3885_v10  ;;  %vm3800_vm1 = vcmp.gt.f32.partialorder %v3768_v11, 0.0 }
 0x299   :  { %v3833_v43 = vmul.f32 0.01, %v3769_v18  ;;  %v4687_v44 = vadd.f32 %v3666_v19, %v5874_v20  ;;  %v3668_v5 = vpop.f32.mrb[21].mxu0  ;;  %vm3801_vm2 = vcmp.gt.f32.partialorder %v3769_v18, 0.0  ;;  %v3863_v6 = vsel %vm3799_vm0, %v3767_v35, %v3831_v39 }
 0x29a   :  { %v3834_v46 = vmul.f32 0.01, %v3770_v4  ;;  %v4688_v47 = vadd.f32 %v3668_v5, %v5876_v21  ;;  %v3670_v48 = vpop.f32.mrb[22].mxu0  ;;  %vm3802_vm3 = vcmp.gt.f32.partialorder %v3770_v4, 0.0  ;;  %v3864_v12 = vsel %vm3800_vm1, %v3768_v11, %v3832_v41 }
 0x29b   :  { %v3727_v49 = vmul.f32 %v4687_v44, %v5898_v38  ;;  %v4689_v50 = vadd.f32 %v3670_v48, %v5878_v22  ;;  %v3672_v51 = vpop.f32.mrb[23].mxu0  ;;  %v3865_v7 = vsel %vm3801_vm2, %v3769_v18, %v3833_v43 }
 0x29c   :  { %v3728_v52 = vmul.f32 %v4688_v47, %v5900_v40  ;;  %v4690_v13 = vadd.f32 %v3672_v51, %v5880_v23  ;;  %v3866_v20 = vsel %vm3802_vm3, %v3770_v4, %v3834_v46  ;;  %v3887_v53 = vpack.c.bf16 %v3865_v7, %v3863_v6 }
 0x29d   :  { %v3771_v54 = vadd.f32 %v5902_v42, %v3727_v49  ;;  %v3729_v21 = vmul.f32 %v4689_v50, %v5898_v38  ;;  %v3888_v55 = vpack.c.bf16 %v3866_v20, %v3864_v12 }
 0x29e   :  { %v3772_v56 = vadd.f32 %v5904_v45, %v3728_v52  ;;  %v3730_v14 = vmul.f32 %v4690_v13, %v5900_v40 }
 0x29f   :  { %v3835_v57 = vmul.f32 0.01, %v3771_v54  ;;  %v3773_v22 = vadd.f32 %v5902_v42, %v3729_v21  ;;  %4087 = vmatprep.mubr.bf16.mxu1 %v3888_v55  ;;  %vm3803_vm4 = vcmp.gt.f32.partialorder %v3771_v54, 0.0 }
 0x2a0   :  { %v3836_v58 = vmul.f32 0.01, %v3772_v56  ;;  %v3774_v15 = vadd.f32 %v5904_v45, %v3730_v14  ;;  %v3676_v23 = vpop.f32.mrb[24].mxu0  ;;  %4088 = vmatmul.mubr.bf16.gmra.mrb[48].mxu1 %v3887_v53  ;;  %vm3804_vm5 = vcmp.gt.f32.partialorder %v3772_v56, 0.0 }
 0x2a1   :  { %v3837_v59 = vmul.f32 0.01, %v3773_v22  ;;  %v4691_v60 = vadd.f32 %v3676_v23, %v5882_v24  ;;  %v3678_v61 = vpop.f32.mrb[25].mxu0  ;;  %vm3805_vm6 = vcmp.gt.f32.partialorder %v3773_v22, 0.0  ;;  %v3867_v8 = vsel %vm3803_vm4, %v3771_v54, %v3835_v57 }
 0x2a2   :  { %v3838_v62 = vmul.f32 0.01, %v3774_v15  ;;  %v4692_v63 = vadd.f32 %v3678_v61, %v5884_v25  ;;  %v3680_v0 = vpop.f32.mrb[26].mxu0  ;;  %vm3806_vm7 = vcmp.gt.f32.partialorder %v3774_v15, 0.0  ;;  %v3868_v3 = vsel %vm3804_vm5, %v3772_v56, %v3836_v58 }
 0x2a3   :  { %v3731_v1 = vmul.f32 %v4691_v60, %v5898_v38  ;;  %v4693_v2 = vadd.f32 %v3680_v0, %v5886_v26  ;;  %v3682_v9 = vpop.f32.mrb[27].mxu0  ;;  %v3869_v28 = vsel %vm3805_vm6, %v3773_v22, %v3837_v59 }
 0x2a4   :  { %v3732_v29 = vmul.f32 %v4692_v63, %v5900_v40  ;;  %v4694_v34 = vadd.f32 %v3682_v9, %v5888_v27  ;;  %v3870_v24 = vsel %vm3806_vm7, %v3774_v15, %v3838_v62  ;;  %v3889_v16 = vpack.c.bf16 %v3869_v28, %v3867_v8 }
 0x2a5   :  { %v3775_v10 = vadd.f32 %v5902_v42, %v3731_v1  ;;  %v3733_v25 = vmul.f32 %v4693_v2, %v5898_v38  ;;  %v3890_v35 = vpack.c.bf16 %v3870_v24, %v3868_v3 }
 0x2a6   :  { %v3776_v17 = vadd.f32 %v5904_v45, %v3732_v29  ;;  %v3734_v36 = vmul.f32 %v4694_v34, %v5900_v40 }
 0x2a7   :  { %v3839_v11 = vmul.f32 0.01, %v3775_v10  ;;  %v3777_v26 = vadd.f32 %v5902_v42, %v3733_v25  ;;  %4095 = vmatprep.mubr.bf16.mxu1 %v3890_v35  ;;  %vm3807_vm8 = vcmp.gt.f32.partialorder %v3775_v10, 0.0 }
 0x2a8   :  { %v3840_v37 = vmul.f32 0.01, %v3776_v17  ;;  %v3778_v39 = vadd.f32 %v5904_v45, %v3734_v36  ;;  %v3686_v27 = vpop.f32.mrb[28].mxu0  ;;  %4096 = vmatmul.mubr.bf16.gmra.mrb[52].mxu1 %v3889_v16  ;;  %vm3808_vm9 = vcmp.gt.f32.partialorder %v3776_v17, 0.0 }
 0x2a9   :  { %v3841_v18 = vmul.f32 0.01, %v3777_v26  ;;  %v4695_v41 = vadd.f32 %v3686_v27, %v5890_v30  ;;  %v3688_v4 = vpop.f32.mrb[29].mxu0  ;;  %vm3809_vm10 = vcmp.gt.f32.partialorder %v3777_v26, 0.0  ;;  %v3871_v5 = vsel %vm3807_vm8, %v3775_v10, %v3839_v11 }
 0x2aa   :  { %v3842_v19 = vmul.f32 0.01, %v3778_v39  ;;  %v4696_v43 = vadd.f32 %v3688_v4, %v5892_v31  ;;  %v3690_v44 = vpop.f32.mrb[30].mxu0  ;;  %vm3810_vm11 = vcmp.gt.f32.partialorder %v3778_v39, 0.0  ;;  %v3872_v6 = vsel %vm3808_vm9, %v3776_v17, %v3840_v37 }
 0x2ab   :  { %v3735_v46 = vmul.f32 %v4695_v41, %v5898_v38  ;;  %v4697_v47 = vadd.f32 %v3690_v44, %v5894_v32  ;;  %v3692_v48 = vpop.f32.mrb[31].mxu0  ;;  %v3873_v49 = vsel %vm3809_vm10, %v3777_v26, %v3841_v18 }
 0x2ac   :  { %v3736_v50 = vmul.f32 %v4696_v43, %v5900_v40  ;;  %v4698_v51 = vadd.f32 %v3692_v48, %v5896_v33  ;;  %v3874_v30 = vsel %vm3810_vm11, %v3778_v39, %v3842_v19  ;;  %v3891_v12 = vpack.c.bf16 %v3873_v49, %v3871_v5 }
 0x2ad   :  { %v3779_v7 = vadd.f32 %v5902_v42, %v3735_v46  ;;  %v3737_v31 = vmul.f32 %v4697_v47, %v5898_v38  ;;  %v3892_v52 = vpack.c.bf16 %v3874_v30, %v3872_v6 }
 0x2ae   :  { %v3780_v13 = vadd.f32 %v5904_v45, %v3736_v50  ;;  %v3738_v20 = vmul.f32 %v4698_v51, %v5900_v40 }
 0x2af   :  { %v3843_v53 = vmul.f32 0.01, %v3779_v7  ;;  %v3781_v32 = vadd.f32 %v5902_v42, %v3737_v31  ;;  %4103 = vmatprep.mubr.bf16.mxu1 %v3892_v52  ;;  %vm3811_vm12 = vcmp.gt.f32.partialorder %v3779_v7, 0.0 }
 0x2b0   :  { %v3844_v54 = vmul.f32 0.01, %v3780_v13  ;;  %v3782_v21 = vadd.f32 %v5904_v45, %v3738_v20  ;;  %4104 = vmatmul.mubr.bf16.gmra.mrb[56].mxu1 %v3891_v12  ;;  %vm3812_vm13 = vcmp.gt.f32.partialorder %v3780_v13, 0.0 }
 0x2b1   :  { %v3845_v33 = vmul.f32 0.01, %v3781_v32  ;;  %vm3813_vm14 = vcmp.gt.f32.partialorder %v3781_v32, 0.0  ;;  %v3875_v38 = vsel %vm3811_vm12, %v3779_v7, %v3843_v53 }
 0x2b2   :  { %v3846_v55 = vmul.f32 0.01, %v3782_v21  ;;  %vm3814_vm15 = vcmp.gt.f32.partialorder %v3782_v21, 0.0  ;;  %v3876_v14 = vsel %vm3812_vm13, %v3780_v13, %v3844_v54 }
 0x2b3   :  { %v3877_v56 = vsel %vm3813_vm14, %v3781_v32, %v3845_v33 }
 0x2b4   :  { %v3878_v57 = vsel %vm3814_vm15, %v3782_v21, %v3846_v55  ;;  %v3893_v22 = vpack.c.bf16 %v3877_v56, %v3875_v38 }
 0x2b5   :  { %v3894_v40 = vpack.c.bf16 %v3878_v57, %v3876_v14 }
 0x2b7   :  { %4111 = vmatprep.mubr.bf16.mxu1 %v3894_v40 }
 0x2b8   :  { %4112 = vmatmul.mubr.bf16.gmra.mrb[60].mxu1 %v3893_v22 }
 0x353   :  { %v4619_v42 = vpop.f32.mrb[32].mxu1 }
 0x354   :  { %v4620_v58 = vpop.f32.mrb[33].mxu1 }
 0x355   :  { %v4621_v15 = vadd.f32 %v4620_v58, %v4619_v42  ;;  %v4622_v23 = vpop.f32.mrb[34].mxu1 }
 0x356   :  { %v4623_v45 = vpop.f32.mrb[35].mxu1 }
 0x357   :  { %4120 = vst [vmem:[#allocation11] sm:$0xff] %v4621_v15  ;;  %v4624_v59 = vadd.f32 %v4623_v45, %v4622_v23 }
 0x359   :  { %4121 = vst [vmem:[#allocation11 + $0x8] sm:$0xff] %v4624_v59 }
 0x35b   :  { %v4625_v60 = vpop.f32.mrb[36].mxu1 }
 0x35c   :  { %v4626_v61 = vpop.f32.mrb[37].mxu1 }
 0x35d   :  { %v4627_v62 = vadd.f32 %v4626_v61, %v4625_v60  ;;  %v4628_v63 = vpop.f32.mrb[38].mxu1 }
 0x35e   :  { %v4629_v0 = vpop.f32.mrb[39].mxu1 }
 0x35f   :  { %4122 = vst [vmem:[#allocation11 + $0x10] sm:$0xff] %v4627_v62  ;;  %v4630_v8 = vadd.f32 %v4629_v0, %v4628_v63 }
 0x361   :  { %4123 = vst [vmem:[#allocation11 + $0x18] sm:$0xff] %v4630_v8 }
 0x363   :  { %v4631_v1 = vpop.f32.mrb[40].mxu1 }
 0x364   :  { %v4632_v2 = vpop.f32.mrb[41].mxu1 }
 0x365   :  { %v4633_v9 = vadd.f32 %v4632_v2, %v4631_v1  ;;  %v4634_v3 = vpop.f32.mrb[42].mxu1 }
 0x366   :  { %v4635_v28 = vpop.f32.mrb[43].mxu1 }
 0x367   :  { %4124 = vst [vmem:[#allocation11 + $0x20] sm:$0xff] %v4633_v9  ;;  %v4636_v29 = vadd.f32 %v4635_v28, %v4634_v3 }
 0x369   :  { %4125 = vst [vmem:[#allocation11 + $0x28] sm:$0xff] %v4636_v29 }
 0x36b   :  { %v4637_v34 = vpop.f32.mrb[44].mxu1 }
 0x36c   :  { %v4638_v24 = vpop.f32.mrb[45].mxu1 }
 0x36d   :  { %v4639_v16 = vadd.f32 %v4638_v24, %v4637_v34  ;;  %v4640_v10 = vpop.f32.mrb[46].mxu1 }
 0x36e   :  { %v4641_v25 = vpop.f32.mrb[47].mxu1 }
 0x36f   :  { %4126 = vst [vmem:[#allocation11 + $0x30] sm:$0xff] %v4639_v16  ;;  %v4642_v35 = vadd.f32 %v4641_v25, %v4640_v10 }
 0x371   :  { %4127 = vst [vmem:[#allocation11 + $0x38] sm:$0xff] %v4642_v35 }
 0x373   :  { %v4643_v17 = vpop.f32.mrb[48].mxu1 }
 0x374   :  { %v4644_v36 = vpop.f32.mrb[49].mxu1 }
 0x375   :  { %v4645_v11 = vadd.f32 %v4644_v36, %v4643_v17  ;;  %v4646_v26 = vpop.f32.mrb[50].mxu1 }
 0x376   :  { %v4647_v37 = vpop.f32.mrb[51].mxu1 }
 0x377   :  { %4128 = vst [vmem:[#allocation11 + $0x40] sm:$0xff] %v4645_v11  ;;  %v4648_v39 = vadd.f32 %v4647_v37, %v4646_v26 }
 0x379   :  { %4129 = vst [vmem:[#allocation11 + $0x48] sm:$0xff] %v4648_v39 }
 0x37b   :  { %v4649_v27 = vpop.f32.mrb[52].mxu1 }
 0x37c   :  { %v4650_v18 = vpop.f32.mrb[53].mxu1 }
 0x37d   :  { %v4651_v41 = vadd.f32 %v4650_v18, %v4649_v27  ;;  %v4652_v4 = vpop.f32.mrb[54].mxu1 }
 0x37e   :  { %v4653_v19 = vpop.f32.mrb[55].mxu1 }
 0x37f   :  { %4130 = vst [vmem:[#allocation11 + $0x50] sm:$0xff] %v4651_v41  ;;  %v4654_v43 = vadd.f32 %v4653_v19, %v4652_v4 }
 0x381   :  { %4131 = vst [vmem:[#allocation11 + $0x58] sm:$0xff] %v4654_v43 }
 0x383   :  { %v4655_v44 = vpop.f32.mrb[56].mxu1 }
 0x384   :  { %v4656_v5 = vpop.f32.mrb[57].mxu1 }
 0x385   :  { %v4657_v46 = vadd.f32 %v4656_v5, %v4655_v44  ;;  %v4658_v47 = vpop.f32.mrb[58].mxu1 }
 0x386   :  { %v4659_v48 = vpop.f32.mrb[59].mxu1 }
 0x387   :  { %4132 = vst [vmem:[#allocation11 + $0x60] sm:$0xff] %v4657_v46  ;;  %v4660_v6 = vadd.f32 %v4659_v48, %v4658_v47 }
 0x389   :  { %4133 = vst [vmem:[#allocation11 + $0x68] sm:$0xff] %v4660_v6 }
 0x38b   :  { %v4661_v49 = vpop.f32.mrb[60].mxu1 }
 0x38c   :  { %v4662_v50 = vpop.f32.mrb[61].mxu1 }
 0x38d   :  { %v4663_v51 = vadd.f32 %v4662_v50, %v4661_v49  ;;  %v4664_v30 = vpop.f32.mrb[62].mxu1 }
 0x38e   :  { %v4665_v12 = vpop.f32.mrb[63].mxu1 }
 0x38f   :  { %4134 = vst [vmem:[#allocation11 + $0x70] sm:$0xff] %v4663_v51  ;;  %v4666_v7 = vadd.f32 %v4665_v12, %v4664_v30 }
 0x391   :  { %4135 = vst [vmem:[#allocation11 + $0x78] sm:$0xff] %v4666_v7 }
 0x392   :  { %5720 = shalt.err (!%p5717_p2)
}
 0x393   :  { %s5721_s12 = scalar_lea.hbm %s6017_s5, 2048 }
 0x394   :  { %p5722_p3 = scmp.ne.s32.totalorder %s6017_s5, %s5721_s12  ;;  %p5725_p4 = scmp.lt.u32.totalorder %s5721_s12, %s6017_s5 }
 0x396   :  { %p5727_p5 = pnand %p5725_p4, %p5722_p3 }
 0x398   :  { %5730 = shalt.err (!%p5727_p5)
}
 0x399   :  { %4147 = dma.vmem_to_hbm [thread:$0]  %s4142_s7, 2048, %s6017_s5, [#allocation4], %s5740_s28, %s5740_s28, %s5741_s29  }
 0x39a   :  { %5737 = dma.done.wait [#allocation4], 2048  }
 0x39b   :  { %5738 = vsyncadd [#allocation4], 4294965248 }
 0x39c   :  { %4151 = vsyncpa [#allocation3], 1 }
 0x39d   :  { %4152 = vsyncpa [#allocation6], 1 }
 0x39e   :  { %4153 = vsyncpa [#allocation9], 1 }
 0x39f   :  { %4154 = vsyncpa [#allocation4], 1 }

</bundles_post_ra>
